<compile_context>
chip_gen: v6e
topology: v6e:2x2x1
jax: 0.10.0
libtpu: 0.0.40
codegen_flags: <defaults>
</compile_context>

<pallas_src>
import functools

import jax
import jax.numpy as jnp
from jax import lax
from jax.experimental import pallas as pl
from jax.experimental.pallas import tpu as pltpu


# ----------------------------- tuning knobs -----------------------------

# Row tile for the fused stem matmul kernel.
#   v7x (64 MiB VMEM):  keep 1024 and vmem_limit <= ~48-56 MiB.
#   v5e / v6e (128 MiB): can be raised to 2048-4096 with vmem_limit ~96 MiB.
_TILE_M = 1024

# Scoped-VMEM request: above the 16/32 MiB defaults, headroom below v7x's 64 MiB.
_VMEM_LIMIT = 48 * 1024 * 1024


# ----------------------------- in-kernel math helpers -----------------------------

def _erf(x):
    # Abramowitz & Stegun 7.1.26 rational approximation (|err| < 1.5e-7).
    a1, a2, a3, a4, a5 = 0.254829592, -0.284496736, 1.421413741, -1.453152027, 1.061405429
    p = 0.3275911
    s = jnp.where(x >= 0.0, 1.0, -1.0)
    ax = jnp.abs(x)
    t = 1.0 / (1.0 + p * ax)
    poly = ((((a5 * t + a4) * t + a3) * t + a2) * t + a1) * t
    return s * (1.0 - poly * jnp.exp(-ax * ax))


def _gelu_erf(x):
    # exact GELU: 0.5 * x * (1 + erf(x / sqrt(2)))
    return 0.5 * x * (1.0 + _erf(x * 0.7071067811865476))


# ----------------------------- Pallas kernels -----------------------------

def _linear_gelu_bn_kernel(x_ref, w_ref, b_ref, scale_ref, shift_ref, o_ref):
    """out = BN_affine(GELU(x @ w + b)); x:(TM,K) bf16, w:(K,N) bf16, b/scale/shift:(1,N) f32."""
    y = jnp.dot(x_ref[...], w_ref[...], preferred_element_type=jnp.float32)
    y = y + b_ref[...]
    y = _gelu_erf(y)
    y = y * scale_ref[...] + shift_ref[...]
    o_ref[...] = y.astype(o_ref.dtype)


def _block_kernel(x_ref, wdw_ref, bdw_ref, s1_ref, sh1_ref,
                  wpw_ref, bpw_ref, s2_ref, sh2_ref,
                  o_ref, xpad_ref, *, ksize, pad, Hp, Wp, C, tile_h):
    """One fused ConvMixer block for one (image, H-tile) grid point.

    x:(Hp,Wp,C) bf16 (full image, resident across H-tiles),
    wdw:(k,k,C) f32, wpw:(C,C) bf16, biases/scales/shifts:(1,C) f32,
    out:(tile_h,Wp,C) bf16, scratch xpad:(Hp+2p,Wp+2p,C) f32.
    """
    h = pl.program_id(1)

    # Build the zero-padded image copy ONCE per image (h == 0).  Only the 2*pad halo
    # rows/columns are zero-filled -- no full-buffer zero pass (saves a whole vst sweep).
    # TODO(synk): a bf16 scratch would halve tap-read bytes; kept f32 to avoid packed
    # sublane-masked stores on the pad-offset interior copy.
    @pl.when(h == 0)
    def _():
        Wpad = Wp + 2 * pad
        zrow = jnp.zeros((pad, Wpad, C), jnp.float32)
        xpad_ref[0:pad, :, :] = zrow
        xpad_ref[pad + Hp:2 * pad + Hp, :, :] = zrow
        zcol = jnp.zeros((Hp, pad, C), jnp.float32)
        xpad_ref[pad:pad + Hp, 0:pad, :] = zcol
        xpad_ref[pad:pad + Hp, pad + Wp:2 * pad + Wp, :] = zcol
        xpad_ref[pad:pad + Hp, pad:pad + Wp, :] = x_ref[...].astype(jnp.float32)

    r0 = pl.multiple_of(h * tile_h, tile_h)

    # ---- depthwise kxk 'same' conv + bias + GELU + BN + residual (f32 accumulation) ----
    def kh_body(kh, acc):
        slab = xpad_ref[pl.ds(r0 + kh, tile_h), :, :]          # (tile_h, Wp+2p, C) f32
        wk = wdw_ref[kh]                                        # (ksize, C) f32
        for kw in range(ksize):                                 # kw unrolled
            acc = acc + slab[:, kw:kw + Wp, :] * wk[kw, :]
        return acc

    acc0 = jnp.zeros((tile_h, Wp, C), jnp.float32)
    # Fully unrolled for small kernels; rolled for k>=7 so tap live-ranges stay bounded.
    acc = lax.fori_loop(0, ksize, kh_body, acc0, unroll=(ksize <= 5))

    y = acc + bdw_ref[...]
    y = _gelu_erf(y)
    y = y * s1_ref[...] + sh1_ref[...]
    res = y + x_ref[pl.ds(r0, tile_h), :, :].astype(jnp.float32)    # Residual(...) add

    # ---- fused 1x1 conv (MXU matmul) + bias + GELU + BN, straight to the output tile ----
    w_pw = wpw_ref[...]
    if Wp % 8 == 0:
        # Sublane-aligned spatial rows: collapse (tile_h, Wp) -> rows, one big MXU call.
        rm = res.reshape(tile_h * Wp, C).astype(jnp.bfloat16)
        z = jnp.dot(rm, w_pw, preferred_element_type=jnp.float32)
        z = z + bpw_ref[...]
        z = _gelu_erf(z)
        z = z * s2_ref[...] + sh2_ref[...]
        o_ref[...] = z.reshape(tile_h, Wp, C).astype(o_ref.dtype)
    else:
        # Wp not 8-aligned: avoid an in-kernel relayouting reshape, feed the MXU per row.
        for t in range(tile_h):
            zt = jnp.dot(res[t].astype(jnp.bfloat16), w_pw,
                         preferred_element_type=jnp.float32)
            zt = zt + bpw_ref[...]
            zt = _gelu_erf(zt)
            zt = zt * s2_ref[...] + sh2_ref[...]
            o_ref[t] = zt.astype(o_ref.dtype)


def _pool_head_kernel(x_ref, w_ref, b_ref, o_ref):
    """Global average pool over the sequence axis then linear head (per batch tile).

    x:(tn,S,C) bf16, w:(C,Ncls_padded) bf16, b:(1,Ncls_padded) f32, out:(tn,Ncls_padded) f32.
    """
    x = x_ref[...].astype(jnp.float32)
    pooled = jnp.mean(x, axis=1)                         # (tn, C) in f32
    y = jnp.dot(pooled.astype(jnp.bfloat16), w_ref[...],
                preferred_element_type=jnp.float32)
    y = y + b_ref[...]
    o_ref[...] = y.astype(o_ref.dtype)


# ----------------------------- pallas_call wrappers -----------------------------

def linear_gelu_bn(x, w, b, scale, shift, *, out_dtype=jnp.bfloat16, tile_m=_TILE_M):
    M, K = x.shape
    _, Nc = w.shape
    tm = min(tile_m, M)                  # full-M block for small problems
    grid_m = pl.cdiv(M, tm)
    x = x.astype(jnp.bfloat16)
    w = w.astype(jnp.bfloat16)
    b = b.astype(jnp.float32)
    return pl.pallas_call(
        _linear_gelu_bn_kernel,
        out_shape=jax.ShapeDtypeStruct((M, Nc), out_dtype),
        grid=(grid_m,),
        in_specs=[
            pl.BlockSpec((tm, K), lambda i: (i, 0)),
            pl.BlockSpec((K, Nc), lambda i: (0, 0)),     # weight resident across row tiles
            pl.BlockSpec((1, Nc), lambda i: (0, 0)),
            pl.BlockSpec((1, Nc), lambda i: (0, 0)),
            pl.BlockSpec((1, Nc), lambda i: (0, 0)),
        ],
        out_specs=pl.BlockSpec((tm, Nc), lambda i: (i, 0)),
        compiler_params=pltpu.CompilerParams(
            dimension_semantics=("parallel",),
            vmem_limit_bytes=_VMEM_LIMIT),
    )(x, w, b, scale, shift)


def _pick_tile_h(Hp, Wp):
    """Largest divisor of Hp giving ~256 MXU rows per tile (and >1 grid step when possible)."""
    target = max(1, min(Hp, -(-256 // Wp)))
    t = target
    while Hp % t != 0:
        t -= 1
    return t


def mixer_block(x, wdw, bdw, s1, sh1, wpw, bpw, s2, sh2, *, ksize, out_dtype=jnp.bfloat16):
    """Fused: Residual(dwconv+GELU+BN) followed by 1x1 conv + GELU + BN, one HBM round trip."""
    N, Hp, Wp, C = x.shape
    pad = (ksize - 1) // 2
    tile_h = _pick_tile_h(Hp, Wp)
    Hq = Hp // tile_h
    kern = functools.partial(_block_kernel, ksize=ksize, pad=pad,
                             Hp=Hp, Wp=Wp, C=C, tile_h=tile_h)
    return pl.pallas_call(
        kern,
        out_shape=jax.ShapeDtypeStruct((N, Hp, Wp, C), out_dtype),
        grid=(N, Hq),
        in_specs=[
            # full image, resident across the H-tile axis (fetched once per image)
            pl.BlockSpec((None, Hp, Wp, C), lambda n, h: (n, 0, 0, 0)),
            pl.BlockSpec((ksize, ksize, C), lambda n, h: (0, 0, 0)),
            pl.BlockSpec((1, C), lambda n, h: (0, 0)),
            pl.BlockSpec((1, C), lambda n, h: (0, 0)),
            pl.BlockSpec((1, C), lambda n, h: (0, 0)),
            pl.BlockSpec((C, C), lambda n, h: (0, 0)),   # 1x1 weight resident
            pl.BlockSpec((1, C), lambda n, h: (0, 0)),
            pl.BlockSpec((1, C), lambda n, h: (0, 0)),
            pl.BlockSpec((1, C), lambda n, h: (0, 0)),
        ],
        out_specs=pl.BlockSpec((None, tile_h, Wp, C), lambda n, h: (n, h, 0, 0)),
        scratch_shapes=[pltpu.VMEM((Hp + 2 * pad, Wp + 2 * pad, C), jnp.float32)],
        compiler_params=pltpu.CompilerParams(
            dimension_semantics=("parallel", "arbitrary"),
            vmem_limit_bytes=_VMEM_LIMIT),
    )(x.astype(jnp.bfloat16), wdw.astype(jnp.float32),
      bdw.astype(jnp.float32), s1, sh1,
      wpw.astype(jnp.bfloat16), bpw.astype(jnp.float32), s2, sh2)


def pool_and_head(x, w, b, *, tile_n=64):
    N, S, C = x.shape
    _, Kcls = w.shape
    tn = min(tile_n, N)                  # == N (full dim) or a multiple of 8
    grid_n = pl.cdiv(N, tn)
    return pl.pallas_call(
        _pool_head_kernel,
        out_shape=jax.ShapeDtypeStruct((N, Kcls), jnp.float32),
        grid=(grid_n,),
        in_specs=[
            pl.BlockSpec((tn, S, C), lambda i: (i, 0, 0)),
            pl.BlockSpec((C, Kcls), lambda i: (0, 0)),
            pl.BlockSpec((1, Kcls), lambda i: (0, 0)),
        ],
        out_specs=pl.BlockSpec((tn, Kcls), lambda i: (i, 0)),
        compiler_params=pltpu.CompilerParams(
            dimension_semantics=("parallel",),
            vmem_limit_bytes=_VMEM_LIMIT),
    )(x.astype(jnp.bfloat16), w.astype(jnp.bfloat16), b.astype(jnp.float32))


# ----------------------------- model glue -----------------------------

def _bn_affine(gamma, beta, mean, var, eps=1e-5):
    scale = gamma / jnp.sqrt(var + eps)
    shift = beta - mean * scale
    return (scale.reshape(1, -1).astype(jnp.float32),
            shift.reshape(1, -1).astype(jnp.float32))


def _round_up(x, m):
    return ((x + m - 1) // m) * m


def convmixer_forward(x_nchw, params, *, patch, ksize):
    """ConvMixer forward. Input x is NCHW (PyTorch convention); output (N, num_classes)."""
    N, C_in, H, W = x_nchw.shape
    dim = params['stem_w'].shape[0]
    Hp, Wp = H // patch, W // patch
    assert ksize % 2 == 1, "padding='same' handled for odd kernels only"

    # --- stem: Conv(p, stride=p) + GELU + BN  (patch-extract in glue, matmul in kernel)
    x = jnp.transpose(x_nchw, (0, 2, 3, 1))                                   # NHWC
    xp = (x.reshape(N, Hp, patch, Wp, patch, C_in)
            .transpose(0, 1, 3, 2, 4, 5)
            .reshape(N * Hp * Wp, patch * patch * C_in))
    w_stem = (params['stem_w'].transpose(2, 3, 1, 0)                          # (p,p,Cin,dim)
              .reshape(patch * patch * C_in, dim))
    K0 = patch * patch * C_in
    Kp = _round_up(K0, 256)                       # 256-aligned contraction dim (v6e/v7x MXU)
    if Kp != K0:
        xp = jnp.pad(xp, ((0, 0), (0, Kp - K0)))
        w_stem = jnp.pad(w_stem, ((0, Kp - K0), (0, 0)))
    s0, sh0 = _bn_affine(*params['stem_bn'])
    y = linear_gelu_bn(xp, w_stem, params['stem_b'].reshape(1, -1), s0, sh0)
    y = y.reshape(N, Hp, Wp, dim)                                             # bf16 activations

    # --- blocks: one fused Pallas kernel per block (dw+GELU+BN+residual then 1x1+GELU+BN)
    for blk in params['blocks']:
        wdw = blk['dw_w'][:, 0].transpose(1, 2, 0)                            # (k,k,dim)
        s1, sh1 = _bn_affine(*blk['bn1'])
        wpw = blk['pw_w'].reshape(dim, dim).T                                 # (in,out)
        s2, sh2 = _bn_affine(*blk['bn2'])
        y = mixer_block(y, wdw, blk['dw_b'].reshape(1, -1), s1, sh1,
                        wpw, blk['pw_b'].reshape(1, -1), s2, sh2, ksize=ksize)

    # --- avg pool (flatten) + Dropout(p=0, identity) + Linear head
    num_classes = params['head_w'].shape[0]
    Ncp = _round_up(num_classes, 128)             # lane-dense output store
    w_head = params['head_w'].T                                               # (dim, classes)
    b_head = params['head_b']
    if Ncp != num_classes:
        w_head = jnp.pad(w_head, ((0, 0), (0, Ncp - num_classes)))
        b_head = jnp.pad(b_head, (0, Ncp - num_classes))
    out = pool_and_head(y.reshape(N, Hp * Wp, dim), w_head, b_head.reshape(1, -1))
    return out[:, :num_classes]


# ----------------------------- deterministic parameter init -----------------------------

def init_params(key, *, dim, depth, ksize, patch, in_chans, num_classes):
    def nrm(k, shape, s=0.05):
        return s * jax.random.normal(k, shape, jnp.float32)

    def bn_params(k):
        k1, k2, k3, k4 = jax.random.split(k, 4)
        gamma = jax.random.uniform(k1, (dim,), jnp.float32, 0.5, 1.5)
        beta = nrm(k2, (dim,), 0.1)
        mean = nrm(k3, (dim,), 0.1)
        var = jax.random.uniform(k4, (dim,), jnp.float32, 0.5, 1.5)
        return (gamma, beta, mean, var)

    keys = jax.random.split(key, 3 + depth)
    p = {}
    ks = jax.random.split(keys[0], 2)
    p['stem_w'] = nrm(ks[0], (dim, in_chans, patch, patch))      # Conv2d weight (PyTorch shape)
    p['stem_b'] = nrm(ks[1], (dim,), 0.02)
    p['stem_bn'] = bn_params(keys[2])
    kh = jax.random.split(keys[1], 2)
    p['head_w'] = nrm(kh[0], (num_classes, dim))                 # nn.Linear weight
    p['head_b'] = nrm(kh[1], (num_classes,), 0.02)
    blocks = []
    for i in range(depth):
        kb = jax.random.split(keys[3 + i], 6)
        blocks.append({
            'dw_w': nrm(kb[0], (dim, 1, ksize, ksize)),          # depthwise conv (groups=dim)
            'dw_b': nrm(kb[1], (dim,), 0.02),
            'bn1': bn_params(kb[2]),
            'pw_w': nrm(kb[3], (dim, dim, 1, 1)),                # 1x1 conv
            'pw_b': nrm(kb[4], (dim,), 0.02),
            'bn2': bn_params(kb[5]),
        })
    p['blocks'] = blocks
    return p


# ----------------------------- main -----------------------------

if __name__ == "__main__":
    # Small ConvMixer config consistent with the module signature:
    # dim=32, depth=2, kernel_size=3, patch_size=7, in_chans=3, num_classes=16
    N, C_in, H, W = 2, 3, 28, 28
    dim, depth, ksize, patch, num_classes = 32, 2, 3, 7, 16

    key = jax.random.PRNGKey(0)
    k_x, k_p = jax.random.split(key)
    x = jax.random.normal(k_x, (N, C_in, H, W), jnp.float32)     # NCHW, like PyTorch
    params = init_params(k_p, dim=dim, depth=depth, ksize=ksize, patch=patch,
                         in_chans=C_in, num_classes=num_classes)

    fwd = jax.jit(functools.partial(convmixer_forward, patch=patch, ksize=ksize))
    out = fwd(x, params)
    out = jax.block_until_ready(out)

    assert out.shape == (N, num_classes), out.shape
    assert bool(jnp.all(jnp.isfinite(out)))
    # TODO(synk): BatchNorm2d is reproduced in eval mode (running-stat affine), not train-mode batch stats.
    print("KERNEL_OK")
</pallas_src>

<mosaic_0001>
module attributes {stable_mosaic.version = 11 : i64} {
  func.func @_linear_gelu_bn_kernel(%arg0: i32, %arg1: memref<32x256xbf16, #tpu.memory_space<vmem>>, %arg2: memref<256x32xbf16, #tpu.memory_space<vmem>>, %arg3: memref<1x32xf32, #tpu.memory_space<vmem>>, %arg4: memref<1x32xf32, #tpu.memory_space<vmem>>, %arg5: memref<1x32xf32, #tpu.memory_space<vmem>>, %arg6: memref<32x32xbf16, #tpu.memory_space<vmem>>) attributes {dimension_semantics = [#tpu.dimension_semantics<parallel>], iteration_bounds = array<i64: 1>, scalar_prefetch = 0 : i64, scratch_operands = 0 : i64, tpu.core_type = #tpu.core_type<tc>, window_params = [{transform_indices = @transform_0, window_bounds = array<i64: 32, 256>}, {pipeline_mode = #tpu.pipeline_mode<synchronous>, transform_indices = @transform_1, window_bounds = array<i64: 256, 32>}, {pipeline_mode = #tpu.pipeline_mode<synchronous>, transform_indices = @transform_2, window_bounds = array<i64: 1, 32>}, {pipeline_mode = #tpu.pipeline_mode<synchronous>, transform_indices = @transform_3, window_bounds = array<i64: 1, 32>}, {pipeline_mode = #tpu.pipeline_mode<synchronous>, transform_indices = @transform_4, window_bounds = array<i64: 1, 32>}, {transform_indices = @transform_5, window_bounds = array<i64: 32, 32>}]} {
    %c0 = arith.constant 0 : index
    %c0_0 = arith.constant 0 : index
    %0 = vector.load %arg1[%c0, %c0_0] : memref<32x256xbf16, #tpu.memory_space<vmem>>, vector<32x256xbf16>
    %c0_1 = arith.constant 0 : index
    %c0_2 = arith.constant 0 : index
    %1 = vector.load %arg2[%c0_1, %c0_2] : memref<256x32xbf16, #tpu.memory_space<vmem>>, vector<256x32xbf16>
    %cst = arith.constant dense<0.000000e+00> : vector<32x32xf32>
    %2 = tpu.matmul %0, %1, %cst {dimension_numbers = #tpu.dot_dimension_numbers<[1], [0], [0], [1], [0, 0, 1, 1], [], []>} : vector<32x256xbf16>, vector<256x32xbf16>, vector<32x32xf32> -> vector<32x32xf32>
    %c0_3 = arith.constant 0 : index
    %c0_4 = arith.constant 0 : index
    %3 = vector.load %arg3[%c0_3, %c0_4] : memref<1x32xf32, #tpu.memory_space<vmem>>, vector<1x32xf32>
    %4 = vector.broadcast %3 : vector<1x32xf32> to vector<32x32xf32>
    %5 = arith.addf %2, %4 : vector<32x32xf32>
    %cst_5 = arith.constant 5.000000e-01 : f32
    %6 = vector.broadcast %cst_5 : f32 to vector<32x32xf32>
    %7 = arith.mulf %6, %5 : vector<32x32xf32>
    %cst_6 = arith.constant 0.707106769 : f32
    %8 = vector.broadcast %cst_6 : f32 to vector<32x32xf32>
    %9 = arith.mulf %5, %8 : vector<32x32xf32>
    %cst_7 = arith.constant 0.000000e+00 : f32
    %10 = vector.broadcast %cst_7 : f32 to vector<32x32xf32>
    %11 = arith.cmpf oge, %9, %10 : vector<32x32xf32>
    %cst_8 = arith.constant 1.000000e+00 : f32
    %cst_9 = arith.constant -1.000000e+00 : f32
    %12 = vector.broadcast %cst_8 : f32 to vector<32x32xf32>
    %13 = vector.broadcast %cst_9 : f32 to vector<32x32xf32>
    %14 = arith.select %11, %12, %13 : vector<32x32xi1>, vector<32x32xf32>
    %15 = math.absf %9 : vector<32x32xf32>
    %cst_10 = arith.constant 0.327591091 : f32
    %16 = vector.broadcast %cst_10 : f32 to vector<32x32xf32>
    %17 = arith.mulf %16, %15 : vector<32x32xf32>
    %cst_11 = arith.constant 1.000000e+00 : f32
    %18 = vector.broadcast %cst_11 : f32 to vector<32x32xf32>
    %19 = arith.addf %18, %17 : vector<32x32xf32>
    %cst_12 = arith.constant 1.000000e+00 : f32
    %20 = vector.broadcast %cst_12 : f32 to vector<32x32xf32>
    %21 = arith.divf %20, %19 : vector<32x32xf32>
    %cst_13 = arith.constant 1.06140542 : f32
    %22 = vector.broadcast %cst_13 : f32 to vector<32x32xf32>
    %23 = arith.mulf %22, %21 : vector<32x32xf32>
    %cst_14 = arith.constant -1.45315206 : f32
    %24 = vector.broadcast %cst_14 : f32 to vector<32x32xf32>
    %25 = arith.addf %23, %24 : vector<32x32xf32>
    %26 = arith.mulf %25, %21 : vector<32x32xf32>
    %cst_15 = arith.constant 1.42141378 : f32
    %27 = vector.broadcast %cst_15 : f32 to vector<32x32xf32>
    %28 = arith.addf %26, %27 : vector<32x32xf32>
    %29 = arith.mulf %28, %21 : vector<32x32xf32>
    %cst_16 = arith.constant -0.284496725 : f32
    %30 = vector.broadcast %cst_16 : f32 to vector<32x32xf32>
    %31 = arith.addf %29, %30 : vector<32x32xf32>
    %32 = arith.mulf %31, %21 : vector<32x32xf32>
    %cst_17 = arith.constant 0.254829586 : f32
    %33 = vector.broadcast %cst_17 : f32 to vector<32x32xf32>
    %34 = arith.addf %32, %33 : vector<32x32xf32>
    %35 = arith.mulf %34, %21 : vector<32x32xf32>
    %cst_18 = arith.constant 0.000000e+00 : f32
    %36 = vector.broadcast %cst_18 : f32 to vector<32x32xf32>
    %37 = arith.subf %36, %15 : vector<32x32xf32>
    %38 = arith.mulf %37, %15 : vector<32x32xf32>
    %39 = math.exp %38 : vector<32x32xf32>
    %40 = arith.mulf %35, %39 : vector<32x32xf32>
    %cst_19 = arith.constant 1.000000e+00 : f32
    %41 = vector.broadcast %cst_19 : f32 to vector<32x32xf32>
    %42 = arith.subf %41, %40 : vector<32x32xf32>
    %43 = arith.mulf %14, %42 : vector<32x32xf32>
    %cst_20 = arith.constant 1.000000e+00 : f32
    %44 = vector.broadcast %cst_20 : f32 to vector<32x32xf32>
    %45 = arith.addf %44, %43 : vector<32x32xf32>
    %46 = arith.mulf %7, %45 : vector<32x32xf32>
    %c0_21 = arith.constant 0 : index
    %c0_22 = arith.constant 0 : index
    %47 = vector.load %arg4[%c0_21, %c0_22] : memref<1x32xf32, #tpu.memory_space<vmem>>, vector<1x32xf32>
    %48 = vector.broadcast %47 : vector<1x32xf32> to vector<32x32xf32>
    %49 = arith.mulf %46, %48 : vector<32x32xf32>
    %c0_23 = arith.constant 0 : index
    %c0_24 = arith.constant 0 : index
    %50 = vector.load %arg5[%c0_23, %c0_24] : memref<1x32xf32, #tpu.memory_space<vmem>>, vector<1x32xf32>
    %51 = vector.broadcast %50 : vector<1x32xf32> to vector<32x32xf32>
    %52 = arith.addf %49, %51 : vector<32x32xf32>
    %53 = arith.truncf %52 : vector<32x32xf32> to vector<32x32xbf16>
    %c0_25 = arith.constant 0 : index
    %c0_26 = arith.constant 0 : index
    %54 = vector.load %arg6[%c0_25, %c0_26] : memref<32x32xbf16, #tpu.memory_space<vmem>>, vector<32x32xbf16>
    tpu.vector_store %arg6[%c0_25, %c0_26], %53 {strides = array<i32>} : memref<32x32xbf16, #tpu.memory_space<vmem>>, vector<32x32xbf16>,
    return
  }
  func.func @transform_0(%arg0: i32) -> (i32, i32) {
    %c0_i32 = arith.constant 0 : i32
    %c0_i32_0 = arith.constant 0 : i32
    return %arg0, %c0_i32 : i32, i32
  }
  func.func @transform_1(%arg0: i32) -> (i32, i32) {
    %c0_i32 = arith.constant 0 : i32
    %c0_i32_0 = arith.constant 0 : i32
    %c0_i32_1 = arith.constant 0 : i32
    return %c0_i32, %c0_i32_0 : i32, i32
  }
  func.func @transform_2(%arg0: i32) -> (i32, i32) {
    %c0_i32 = arith.constant 0 : i32
    %c0_i32_0 = arith.constant 0 : i32
    %c0_i32_1 = arith.constant 0 : i32
    return %c0_i32, %c0_i32_0 : i32, i32
  }
  func.func @transform_3(%arg0: i32) -> (i32, i32) {
    %c0_i32 = arith.constant 0 : i32
    %c0_i32_0 = arith.constant 0 : i32
    %c0_i32_1 = arith.constant 0 : i32
    return %c0_i32, %c0_i32_0 : i32, i32
  }
  func.func @transform_4(%arg0: i32) -> (i32, i32) {
    %c0_i32 = arith.constant 0 : i32
    %c0_i32_0 = arith.constant 0 : i32
    %c0_i32_1 = arith.constant 0 : i32
    return %c0_i32, %c0_i32_0 : i32, i32
  }
  func.func @transform_5(%arg0: i32) -> (i32, i32) {
    %c0_i32 = arith.constant 0 : i32
    %c0_i32_0 = arith.constant 0 : i32
    return %arg0, %c0_i32 : i32, i32
  }
}

module attributes {stable_mosaic.version = 11 : i64} {
  func.func @_block_kernel(%arg0: i32, %arg1: i32, %arg2: memref<1x4x4x32xbf16, #tpu.memory_space<vmem>>, %arg3: memref<3x3x32xf32, #tpu.memory_space<vmem>>, %arg4: memref<1x32xf32, #tpu.memory_space<vmem>>, %arg5: memref<1x32xf32, #tpu.memory_space<vmem>>, %arg6: memref<1x32xf32, #tpu.memory_space<vmem>>, %arg7: memref<32x32xbf16, #tpu.memory_space<vmem>>, %arg8: memref<1x32xf32, #tpu.memory_space<vmem>>, %arg9: memref<1x32xf32, #tpu.memory_space<vmem>>, %arg10: memref<1x32xf32, #tpu.memory_space<vmem>>, %arg11: memref<1x4x4x32xbf16, #tpu.memory_space<vmem>>, %arg12: memref<6x6x32xf32, #tpu.memory_space<vmem>>) attributes {dimension_semantics = [#tpu.dimension_semantics<parallel>, #tpu.dimension_semantics<arbitrary>], iteration_bounds = array<i64: 2, 1>, scalar_prefetch = 0 : i64, scratch_operands = 1 : i64, tpu.core_type = #tpu.core_type<tc>, window_params = [{transform_indices = @transform_0, window_bounds = array<i64: 1, 4, 4, 32>}, {pipeline_mode = #tpu.pipeline_mode<synchronous>, transform_indices = @transform_1, window_bounds = array<i64: 3, 3, 32>}, {pipeline_mode = #tpu.pipeline_mode<synchronous>, transform_indices = @transform_2, window_bounds = array<i64: 1, 32>}, {pipeline_mode = #tpu.pipeline_mode<synchronous>, transform_indices = @transform_3, window_bounds = array<i64: 1, 32>}, {pipeline_mode = #tpu.pipeline_mode<synchronous>, transform_indices = @transform_4, window_bounds = array<i64: 1, 32>}, {pipeline_mode = #tpu.pipeline_mode<synchronous>, transform_indices = @transform_5, window_bounds = array<i64: 32, 32>}, {pipeline_mode = #tpu.pipeline_mode<synchronous>, transform_indices = @transform_6, window_bounds = array<i64: 1, 32>}, {pipeline_mode = #tpu.pipeline_mode<synchronous>, transform_indices = @transform_7, window_bounds = array<i64: 1, 32>}, {pipeline_mode = #tpu.pipeline_mode<synchronous>, transform_indices = @transform_8, window_bounds = array<i64: 1, 32>}, {transform_indices = @transform_9, window_bounds = array<i64: 1, 4, 4, 32>}]} {
    %c0_i32 = arith.constant 0 : i32
    %0 = arith.cmpi eq, %arg1, %c0_i32 : i32
    %1 = arith.extui %0 : i1 to i32
    %c0_i32_0 = arith.constant 0 : i32
    %2 = arith.cmpi ne, %1, %c0_i32_0 : i32
    scf.if %2 {
      %cst_145 = arith.constant 0.000000e+00 : f32
      %378 = vector.broadcast %cst_145 : f32 to vector<1x6x32xf32>
      %c0_146 = arith.constant 0 : index
      %c0_147 = arith.constant 0 : index
      %c0_148 = arith.constant 0 : index
      %379 = vector.load %arg12[%c0_146, %c0_147, %c0_148] : memref<6x6x32xf32, #tpu.memory_space<vmem>>, vector<1x6x32xf32>
      tpu.vector_store %arg12[%c0_146, %c0_147, %c0_148], %378 {strides = array<i32>} : memref<6x6x32xf32, #tpu.memory_space<vmem>>, vector<1x6x32xf32>,
      %c5 = arith.constant 5 : index
      %c0_149 = arith.constant 0 : index
      %c0_150 = arith.constant 0 : index
      %380 = vector.load %arg12[%c5, %c0_149, %c0_150] : memref<6x6x32xf32, #tpu.memory_space<vmem>>, vector<1x6x32xf32>
      tpu.vector_store %arg12[%c5, %c0_149, %c0_150], %378 {strides = array<i32>} : memref<6x6x32xf32, #tpu.memory_space<vmem>>, vector<1x6x32xf32>,
      %cst_151 = arith.constant 0.000000e+00 : f32
      %381 = vector.broadcast %cst_151 : f32 to vector<4x1x32xf32>
      %c1_152 = arith.constant 1 : index
      %c0_153 = arith.constant 0 : index
      %c0_154 = arith.constant 0 : index
      %382 = vector.load %arg12[%c1_152, %c0_153, %c0_154] : memref<6x6x32xf32, #tpu.memory_space<vmem>>, vector<4x1x32xf32>
      tpu.vector_store %arg12[%c1_152, %c0_153, %c0_154], %381 {strides = array<i32>} : memref<6x6x32xf32, #tpu.memory_space<vmem>>, vector<4x1x32xf32>,
      %c1_155 = arith.constant 1 : index
      %c5_156 = arith.constant 5 : index
      %c0_157 = arith.constant 0 : index
      %383 = vector.load %arg12[%c1_155, %c5_156, %c0_157] : memref<6x6x32xf32, #tpu.memory_space<vmem>>, vector<4x1x32xf32>
      tpu.vector_store %arg12[%c1_155, %c5_156, %c0_157], %381 {strides = array<i32>} : memref<6x6x32xf32, #tpu.memory_space<vmem>>, vector<4x1x32xf32>,
      %c0_158 = arith.constant 0 : index
      %c0_159 = arith.constant 0 : index
      %c0_160 = arith.constant 0 : index
      %c0_161 = arith.constant 0 : index
      %384 = vector.load %arg2[%c0_158, %c0_159, %c0_160, %c0_161] : memref<1x4x4x32xbf16, #tpu.memory_space<vmem>>, vector<1x4x4x32xbf16>
      %385 = vector.shape_cast %384 : vector<1x4x4x32xbf16> to vector<4x4x32xbf16>
      %386 = arith.extf %385 : vector<4x4x32xbf16> to vector<4x4x32xf32>
      %c1_162 = arith.constant 1 : index
      %c1_163 = arith.constant 1 : index
      %c0_164 = arith.constant 0 : index
      %387 = vector.load %arg12[%c1_162, %c1_163, %c0_164] : memref<6x6x32xf32, #tpu.memory_space<vmem>>, vector<4x4x32xf32>
      tpu.vector_store %arg12[%c1_162, %c1_163, %c0_164], %386 {strides = array<i32>} : memref<6x6x32xf32, #tpu.memory_space<vmem>>, vector<4x4x32xf32>,
    } else {
    }
    %c4_i32 = arith.constant 4 : i32
    %3 = arith.muli %arg1, %c4_i32 : i32
    %4 = tpu.assume_multiple %3, 4 : i32
    %cst = arith.constant 0.000000e+00 : f32
    %5 = vector.broadcast %cst : f32 to vector<4x4x32xf32>
    %c0_i32_1 = arith.constant 0 : i32
    %6 = arith.addi %4, %c0_i32_1 : i32
    %7 = arith.index_cast %6 : i32 to index
    %c0 = arith.constant 0 : index
    %c0_2 = arith.constant 0 : index
    %8 = vector.load %arg12[%7, %c0, %c0_2] : memref<6x6x32xf32, #tpu.memory_space<vmem>>, vector<4x6x32xf32>
    %9 = arith.index_cast %c0_i32_1 : i32 to index
    %c0_3 = arith.constant 0 : index
    %c0_4 = arith.constant 0 : index
    %10 = vector.load %arg3[%9, %c0_3, %c0_4] : memref<3x3x32xf32, #tpu.memory_space<vmem>>, vector<1x3x32xf32>
    %11 = vector.shape_cast %10 : vector<1x3x32xf32> to vector<3x32xf32>
    %12 = vector.extract_strided_slice %8 {offsets = [0, 0, 0], sizes = [4, 4, 32], strides = [1, 1, 1]} : vector<4x6x32xf32> to vector<4x4x32xf32>
    %13 = vector.extract_strided_slice %11 {offsets = [0, 0], sizes = [1, 32], strides = [1, 1]} : vector<3x32xf32> to vector<1x32xf32>
    %14 = vector.shape_cast %13 : vector<1x32xf32> to vector<32xf32>
    %15 = vector.shape_cast %14 : vector<32xf32> to vector<1x1x32xf32>
    %16 = vector.broadcast %15 : vector<1x1x32xf32> to vector<4x4x32xf32>
    %17 = arith.mulf %12, %16 : vector<4x4x32xf32>
    %18 = arith.addf %5, %17 : vector<4x4x32xf32>
    %19 = vector.extract_strided_slice %8 {offsets = [0, 1, 0], sizes = [4, 4, 32], strides = [1, 1, 1]} : vector<4x6x32xf32> to vector<4x4x32xf32>
    %20 = vector.extract_strided_slice %11 {offsets = [1, 0], sizes = [1, 32], strides = [1, 1]} : vector<3x32xf32> to vector<1x32xf32>
    %21 = vector.shape_cast %20 : vector<1x32xf32> to vector<32xf32>
    %22 = vector.shape_cast %21 : vector<32xf32> to vector<1x1x32xf32>
    %23 = vector.broadcast %22 : vector<1x1x32xf32> to vector<4x4x32xf32>
    %24 = arith.mulf %19, %23 : vector<4x4x32xf32>
    %25 = arith.addf %18, %24 : vector<4x4x32xf32>
    %26 = vector.extract_strided_slice %8 {offsets = [0, 2, 0], sizes = [4, 4, 32], strides = [1, 1, 1]} : vector<4x6x32xf32> to vector<4x4x32xf32>
    %27 = vector.extract_strided_slice %11 {offsets = [2, 0], sizes = [1, 32], strides = [1, 1]} : vector<3x32xf32> to vector<1x32xf32>
    %28 = vector.shape_cast %27 : vector<1x32xf32> to vector<32xf32>
    %29 = vector.shape_cast %28 : vector<32xf32> to vector<1x1x32xf32>
    %30 = vector.broadcast %29 : vector<1x1x32xf32> to vector<4x4x32xf32>
    %31 = arith.mulf %26, %30 : vector<4x4x32xf32>
    %32 = arith.addf %25, %31 : vector<4x4x32xf32>
    %c1_i32 = arith.constant 1 : i32
    %33 = arith.addi %4, %c1_i32 : i32
    %34 = arith.index_cast %33 : i32 to index
    %c0_5 = arith.constant 0 : index
    %c0_6 = arith.constant 0 : index
    %35 = vector.load %arg12[%34, %c0_5, %c0_6] : memref<6x6x32xf32, #tpu.memory_space<vmem>>, vector<4x6x32xf32>
    %36 = arith.index_cast %c1_i32 : i32 to index
    %c0_7 = arith.constant 0 : index
    %c0_8 = arith.constant 0 : index
    %37 = vector.load %arg3[%36, %c0_7, %c0_8] : memref<3x3x32xf32, #tpu.memory_space<vmem>>, vector<1x3x32xf32>
    %38 = vector.shape_cast %37 : vector<1x3x32xf32> to vector<3x32xf32>
    %39 = vector.extract_strided_slice %35 {offsets = [0, 0, 0], sizes = [4, 4, 32], strides = [1, 1, 1]} : vector<4x6x32xf32> to vector<4x4x32xf32>
    %40 = vector.extract_strided_slice %38 {offsets = [0, 0], sizes = [1, 32], strides = [1, 1]} : vector<3x32xf32> to vector<1x32xf32>
    %41 = vector.shape_cast %40 : vector<1x32xf32> to vector<32xf32>
    %42 = vector.shape_cast %41 : vector<32xf32> to vector<1x1x32xf32>
    %43 = vector.broadcast %42 : vector<1x1x32xf32> to vector<4x4x32xf32>
    %44 = arith.mulf %39, %43 : vector<4x4x32xf32>
    %45 = arith.addf %32, %44 : vector<4x4x32xf32>
    %46 = vector.extract_strided_slice %35 {offsets = [0, 1, 0], sizes = [4, 4, 32], strides = [1, 1, 1]} : vector<4x6x32xf32> to vector<4x4x32xf32>
    %47 = vector.extract_strided_slice %38 {offsets = [1, 0], sizes = [1, 32], strides = [1, 1]} : vector<3x32xf32> to vector<1x32xf32>
    %48 = vector.shape_cast %47 : vector<1x32xf32> to vector<32xf32>
    %49 = vector.shape_cast %48 : vector<32xf32> to vector<1x1x32xf32>
    %50 = vector.broadcast %49 : vector<1x1x32xf32> to vector<4x4x32xf32>
    %51 = arith.mulf %46, %50 : vector<4x4x32xf32>
    %52 = arith.addf %45, %51 : vector<4x4x32xf32>
    %53 = vector.extract_strided_slice %35 {offsets = [0, 2, 0], sizes = [4, 4, 32], strides = [1, 1, 1]} : vector<4x6x32xf32> to vector<4x4x32xf32>
    %54 = vector.extract_strided_slice %38 {offsets = [2, 0], sizes = [1, 32], strides = [1, 1]} : vector<3x32xf32> to vector<1x32xf32>
    %55 = vector.shape_cast %54 : vector<1x32xf32> to vector<32xf32>
    %56 = vector.shape_cast %55 : vector<32xf32> to vector<1x1x32xf32>
    %57 = vector.broadcast %56 : vector<1x1x32xf32> to vector<4x4x32xf32>
    %58 = arith.mulf %53, %57 : vector<4x4x32xf32>
    %59 = arith.addf %52, %58 : vector<4x4x32xf32>
    %c2_i32 = arith.constant 2 : i32
    %60 = arith.addi %4, %c2_i32 : i32
    %61 = arith.index_cast %60 : i32 to index
    %c0_9 = arith.constant 0 : index
    %c0_10 = arith.constant 0 : index
    %62 = vector.load %arg12[%61, %c0_9, %c0_10] : memref<6x6x32xf32, #tpu.memory_space<vmem>>, vector<4x6x32xf32>
    %63 = arith.index_cast %c2_i32 : i32 to index
    %c0_11 = arith.constant 0 : index
    %c0_12 = arith.constant 0 : index
    %64 = vector.load %arg3[%63, %c0_11, %c0_12] : memref<3x3x32xf32, #tpu.memory_space<vmem>>, vector<1x3x32xf32>
    %65 = vector.shape_cast %64 : vector<1x3x32xf32> to vector<3x32xf32>
    %66 = vector.extract_strided_slice %62 {offsets = [0, 0, 0], sizes = [4, 4, 32], strides = [1, 1, 1]} : vector<4x6x32xf32> to vector<4x4x32xf32>
    %67 = vector.extract_strided_slice %65 {offsets = [0, 0], sizes = [1, 32], strides = [1, 1]} : vector<3x32xf32> to vector<1x32xf32>
    %68 = vector.shape_cast %67 : vector<1x32xf32> to vector<32xf32>
    %69 = vector.shape_cast %68 : vector<32xf32> to vector<1x1x32xf32>
    %70 = vector.broadcast %69 : vector<1x1x32xf32> to vector<4x4x32xf32>
    %71 = arith.mulf %66, %70 : vector<4x4x32xf32>
    %72 = arith.addf %59, %71 : vector<4x4x32xf32>
    %73 = vector.extract_strided_slice %62 {offsets = [0, 1, 0], sizes = [4, 4, 32], strides = [1, 1, 1]} : vector<4x6x32xf32> to vector<4x4x32xf32>
    %74 = vector.extract_strided_slice %65 {offsets = [1, 0], sizes = [1, 32], strides = [1, 1]} : vector<3x32xf32> to vector<1x32xf32>
    %75 = vector.shape_cast %74 : vector<1x32xf32> to vector<32xf32>
    %76 = vector.shape_cast %75 : vector<32xf32> to vector<1x1x32xf32>
    %77 = vector.broadcast %76 : vector<1x1x32xf32> to vector<4x4x32xf32>
    %78 = arith.mulf %73, %77 : vector<4x4x32xf32>
    %79 = arith.addf %72, %78 : vector<4x4x32xf32>
    %80 = vector.extract_strided_slice %62 {offsets = [0, 2, 0], sizes = [4, 4, 32], strides = [1, 1, 1]} : vector<4x6x32xf32> to vector<4x4x32xf32>
    %81 = vector.extract_strided_slice %65 {offsets = [2, 0], sizes = [1, 32], strides = [1, 1]} : vector<3x32xf32> to vector<1x32xf32>
    %82 = vector.shape_cast %81 : vector<1x32xf32> to vector<32xf32>
    %83 = vector.shape_cast %82 : vector<32xf32> to vector<1x1x32xf32>
    %84 = vector.broadcast %83 : vector<1x1x32xf32> to vector<4x4x32xf32>
    %85 = arith.mulf %80, %84 : vector<4x4x32xf32>
    %86 = arith.addf %79, %85 : vector<4x4x32xf32>
    %c3_i32 = arith.constant 3 : i32
    %c0_13 = arith.constant 0 : index
    %c0_14 = arith.constant 0 : index
    %87 = vector.load %arg4[%c0_13, %c0_14] : memref<1x32xf32, #tpu.memory_space<vmem>>, vector<1x32xf32>
    %88 = vector.shape_cast %87 : vector<1x32xf32> to vector<1x1x32xf32>
    %89 = vector.broadcast %88 : vector<1x1x32xf32> to vector<4x4x32xf32>
    %90 = arith.addf %86, %89 : vector<4x4x32xf32>
    %cst_15 = arith.constant 5.000000e-01 : f32
    %91 = vector.broadcast %cst_15 : f32 to vector<4x4x32xf32>
    %92 = arith.mulf %91, %90 : vector<4x4x32xf32>
    %cst_16 = arith.constant 0.707106769 : f32
    %93 = vector.broadcast %cst_16 : f32 to vector<4x4x32xf32>
    %94 = arith.mulf %90, %93 : vector<4x4x32xf32>
    %cst_17 = arith.constant 0.000000e+00 : f32
    %95 = vector.broadcast %cst_17 : f32 to vector<4x4x32xf32>
    %96 = arith.cmpf oge, %94, %95 : vector<4x4x32xf32>
    %cst_18 = arith.constant 1.000000e+00 : f32
    %cst_19 = arith.constant -1.000000e+00 : f32
    %97 = vector.broadcast %cst_18 : f32 to vector<4x4x32xf32>
    %98 = vector.broadcast %cst_19 : f32 to vector<4x4x32xf32>
    %99 = arith.select %96, %97, %98 : vector<4x4x32xi1>, vector<4x4x32xf32>
    %100 = math.absf %94 : vector<4x4x32xf32>
    %cst_20 = arith.constant 0.327591091 : f32
    %101 = vector.broadcast %cst_20 : f32 to vector<4x4x32xf32>
    %102 = arith.mulf %101, %100 : vector<4x4x32xf32>
    %cst_21 = arith.constant 1.000000e+00 : f32
    %103 = vector.broadcast %cst_21 : f32 to vector<4x4x32xf32>
    %104 = arith.addf %103, %102 : vector<4x4x32xf32>
    %cst_22 = arith.constant 1.000000e+00 : f32
    %105 = vector.broadcast %cst_22 : f32 to vector<4x4x32xf32>
    %106 = arith.divf %105, %104 : vector<4x4x32xf32>
    %cst_23 = arith.constant 1.06140542 : f32
    %107 = vector.broadcast %cst_23 : f32 to vector<4x4x32xf32>
    %108 = arith.mulf %107, %106 : vector<4x4x32xf32>
    %cst_24 = arith.constant -1.45315206 : f32
    %109 = vector.broadcast %cst_24 : f32 to vector<4x4x32xf32>
    %110 = arith.addf %108, %109 : vector<4x4x32xf32>
    %111 = arith.mulf %110, %106 : vector<4x4x32xf32>
    %cst_25 = arith.constant 1.42141378 : f32
    %112 = vector.broadcast %cst_25 : f32 to vector<4x4x32xf32>
    %113 = arith.addf %111, %112 : vector<4x4x32xf32>
    %114 = arith.mulf %113, %106 : vector<4x4x32xf32>
    %cst_26 = arith.constant -0.284496725 : f32
    %115 = vector.broadcast %cst_26 : f32 to vector<4x4x32xf32>
    %116 = arith.addf %114, %115 : vector<4x4x32xf32>
    %117 = arith.mulf %116, %106 : vector<4x4x32xf32>
    %cst_27 = arith.constant 0.254829586 : f32
    %118 = vector.broadcast %cst_27 : f32 to vector<4x4x32xf32>
    %119 = arith.addf %117, %118 : vector<4x4x32xf32>
    %120 = arith.mulf %119, %106 : vector<4x4x32xf32>
    %cst_28 = arith.constant 0.000000e+00 : f32
    %121 = vector.broadcast %cst_28 : f32 to vector<4x4x32xf32>
    %122 = arith.subf %121, %100 : vector<4x4x32xf32>
    %123 = arith.mulf %122, %100 : vector<4x4x32xf32>
    %124 = math.exp %123 : vector<4x4x32xf32>
    %125 = arith.mulf %120, %124 : vector<4x4x32xf32>
    %cst_29 = arith.constant 1.000000e+00 : f32
    %126 = vector.broadcast %cst_29 : f32 to vector<4x4x32xf32>
    %127 = arith.subf %126, %125 : vector<4x4x32xf32>
    %128 = arith.mulf %99, %127 : vector<4x4x32xf32>
    %cst_30 = arith.constant 1.000000e+00 : f32
    %129 = vector.broadcast %cst_30 : f32 to vector<4x4x32xf32>
    %130 = arith.addf %129, %128 : vector<4x4x32xf32>
    %131 = arith.mulf %92, %130 : vector<4x4x32xf32>
    %c0_31 = arith.constant 0 : index
    %c0_32 = arith.constant 0 : index
    %132 = vector.load %arg5[%c0_31, %c0_32] : memref<1x32xf32, #tpu.memory_space<vmem>>, vector<1x32xf32>
    %133 = vector.shape_cast %132 : vector<1x32xf32> to vector<1x1x32xf32>
    %134 = vector.broadcast %133 : vector<1x1x32xf32> to vector<4x4x32xf32>
    %135 = arith.mulf %131, %134 : vector<4x4x32xf32>
    %c0_33 = arith.constant 0 : index
    %c0_34 = arith.constant 0 : index
    %136 = vector.load %arg6[%c0_33, %c0_34] : memref<1x32xf32, #tpu.memory_space<vmem>>, vector<1x32xf32>
    %137 = vector.shape_cast %136 : vector<1x32xf32> to vector<1x1x32xf32>
    %138 = vector.broadcast %137 : vector<1x1x32xf32> to vector<4x4x32xf32>
    %139 = arith.addf %135, %138 : vector<4x4x32xf32>
    %c0_35 = arith.constant 0 : index
    %140 = arith.index_cast %4 : i32 to index
    %c0_36 = arith.constant 0 : index
    %c0_37 = arith.constant 0 : index
    %141 = vector.load %arg2[%c0_35, %140, %c0_36, %c0_37] : memref<1x4x4x32xbf16, #tpu.memory_space<vmem>>, vector<1x4x4x32xbf16>
    %142 = vector.shape_cast %141 : vector<1x4x4x32xbf16> to vector<4x4x32xbf16>
    %143 = arith.extf %142 : vector<4x4x32xbf16> to vector<4x4x32xf32>
    %144 = arith.addf %139, %143 : vector<4x4x32xf32>
    %c0_38 = arith.constant 0 : index
    %c0_39 = arith.constant 0 : index
    %145 = vector.load %arg7[%c0_38, %c0_39] : memref<32x32xbf16, #tpu.memory_space<vmem>>, vector<32x32xbf16>
    %146 = vector.extract_strided_slice %144 {offsets = [0, 0, 0], sizes = [1, 4, 32], strides = [1, 1, 1]} : vector<4x4x32xf32> to vector<1x4x32xf32>
    %147 = vector.shape_cast %146 : vector<1x4x32xf32> to vector<4x32xf32>
    %148 = arith.truncf %147 : vector<4x32xf32> to vector<4x32xbf16>
    %cst_40 = arith.constant dense<0.000000e+00> : vector<4x32xf32>
    %149 = tpu.matmul %148, %145, %cst_40 {dimension_numbers = #tpu.dot_dimension_numbers<[1], [0], [0], [1], [0, 0, 1, 1], [], []>} : vector<4x32xbf16>, vector<32x32xbf16>, vector<4x32xf32> -> vector<4x32xf32>
    %c0_41 = arith.constant 0 : index
    %c0_42 = arith.constant 0 : index
    %150 = vector.load %arg8[%c0_41, %c0_42] : memref<1x32xf32, #tpu.memory_space<vmem>>, vector<1x32xf32>
    %151 = vector.broadcast %150 : vector<1x32xf32> to vector<4x32xf32>
    %152 = arith.addf %149, %151 : vector<4x32xf32>
    %cst_43 = arith.constant 5.000000e-01 : f32
    %153 = vector.broadcast %cst_43 : f32 to vector<4x32xf32>
    %154 = arith.mulf %153, %152 : vector<4x32xf32>
    %cst_44 = arith.constant 0.707106769 : f32
    %155 = vector.broadcast %cst_44 : f32 to vector<4x32xf32>
    %156 = arith.mulf %152, %155 : vector<4x32xf32>
    %cst_45 = arith.constant 0.000000e+00 : f32
    %157 = vector.broadcast %cst_45 : f32 to vector<4x32xf32>
    %158 = arith.cmpf oge, %156, %157 : vector<4x32xf32>
    %cst_46 = arith.constant 1.000000e+00 : f32
    %cst_47 = arith.constant -1.000000e+00 : f32
    %159 = vector.broadcast %cst_46 : f32 to vector<4x32xf32>
    %160 = vector.broadcast %cst_47 : f32 to vector<4x32xf32>
    %161 = arith.select %158, %159, %160 : vector<4x32xi1>, vector<4x32xf32>
    %162 = math.absf %156 : vector<4x32xf32>
    %cst_48 = arith.constant 0.327591091 : f32
    %163 = vector.broadcast %cst_48 : f32 to vector<4x32xf32>
    %164 = arith.mulf %163, %162 : vector<4x32xf32>
    %cst_49 = arith.constant 1.000000e+00 : f32
    %165 = vector.broadcast %cst_49 : f32 to vector<4x32xf32>
    %166 = arith.addf %165, %164 : vector<4x32xf32>
    %cst_50 = arith.constant 1.000000e+00 : f32
    %167 = vector.broadcast %cst_50 : f32 to vector<4x32xf32>
    %168 = arith.divf %167, %166 : vector<4x32xf32>
    %cst_51 = arith.constant 1.06140542 : f32
    %169 = vector.broadcast %cst_51 : f32 to vector<4x32xf32>
    %170 = arith.mulf %169, %168 : vector<4x32xf32>
    %cst_52 = arith.constant -1.45315206 : f32
    %171 = vector.broadcast %cst_52 : f32 to vector<4x32xf32>
    %172 = arith.addf %170, %171 : vector<4x32xf32>
    %173 = arith.mulf %172, %168 : vector<4x32xf32>
    %cst_53 = arith.constant 1.42141378 : f32
    %174 = vector.broadcast %cst_53 : f32 to vector<4x32xf32>
    %175 = arith.addf %173, %174 : vector<4x32xf32>
    %176 = arith.mulf %175, %168 : vector<4x32xf32>
    %cst_54 = arith.constant -0.284496725 : f32
    %177 = vector.broadcast %cst_54 : f32 to vector<4x32xf32>
    %178 = arith.addf %176, %177 : vector<4x32xf32>
    %179 = arith.mulf %178, %168 : vector<4x32xf32>
    %cst_55 = arith.constant 0.254829586 : f32
    %180 = vector.broadcast %cst_55 : f32 to vector<4x32xf32>
    %181 = arith.addf %179, %180 : vector<4x32xf32>
    %182 = arith.mulf %181, %168 : vector<4x32xf32>
    %cst_56 = arith.constant 0.000000e+00 : f32
    %183 = vector.broadcast %cst_56 : f32 to vector<4x32xf32>
    %184 = arith.subf %183, %162 : vector<4x32xf32>
    %185 = arith.mulf %184, %162 : vector<4x32xf32>
    %186 = math.exp %185 : vector<4x32xf32>
    %187 = arith.mulf %182, %186 : vector<4x32xf32>
    %cst_57 = arith.constant 1.000000e+00 : f32
    %188 = vector.broadcast %cst_57 : f32 to vector<4x32xf32>
    %189 = arith.subf %188, %187 : vector<4x32xf32>
    %190 = arith.mulf %161, %189 : vector<4x32xf32>
    %cst_58 = arith.constant 1.000000e+00 : f32
    %191 = vector.broadcast %cst_58 : f32 to vector<4x32xf32>
    %192 = arith.addf %191, %190 : vector<4x32xf32>
    %193 = arith.mulf %154, %192 : vector<4x32xf32>
    %c0_59 = arith.constant 0 : index
    %c0_60 = arith.constant 0 : index
    %194 = vector.load %arg9[%c0_59, %c0_60] : memref<1x32xf32, #tpu.memory_space<vmem>>, vector<1x32xf32>
    %195 = vector.broadcast %194 : vector<1x32xf32> to vector<4x32xf32>
    %196 = arith.mulf %193, %195 : vector<4x32xf32>
    %c0_61 = arith.constant 0 : index
    %c0_62 = arith.constant 0 : index
    %197 = vector.load %arg10[%c0_61, %c0_62] : memref<1x32xf32, #tpu.memory_space<vmem>>, vector<1x32xf32>
    %198 = vector.broadcast %197 : vector<1x32xf32> to vector<4x32xf32>
    %199 = arith.addf %196, %198 : vector<4x32xf32>
    %200 = arith.truncf %199 : vector<4x32xf32> to vector<4x32xbf16>
    %c0_63 = arith.constant 0 : index
    %c0_64 = arith.constant 0 : index
    %c0_65 = arith.constant 0 : index
    %c0_66 = arith.constant 0 : index
    %201 = vector.load %arg11[%c0_63, %c0_64, %c0_65, %c0_66] : memref<1x4x4x32xbf16, #tpu.memory_space<vmem>>, vector<1x1x4x32xbf16>
    %202 = vector.shape_cast %201 : vector<1x1x4x32xbf16> to vector<4x32xbf16>
    %203 = vector.shape_cast %200 : vector<4x32xbf16> to vector<1x1x4x32xbf16>
    tpu.vector_store %arg11[%c0_63, %c0_64, %c0_65, %c0_66], %203 {strides = array<i32>} : memref<1x4x4x32xbf16, #tpu.memory_space<vmem>>, vector<1x1x4x32xbf16>,
    %204 = vector.extract_strided_slice %144 {offsets = [1, 0, 0], sizes = [1, 4, 32], strides = [1, 1, 1]} : vector<4x4x32xf32> to vector<1x4x32xf32>
    %205 = vector.shape_cast %204 : vector<1x4x32xf32> to vector<4x32xf32>
    %206 = arith.truncf %205 : vector<4x32xf32> to vector<4x32xbf16>
    %cst_67 = arith.constant dense<0.000000e+00> : vector<4x32xf32>
    %207 = tpu.matmul %206, %145, %cst_67 {dimension_numbers = #tpu.dot_dimension_numbers<[1], [0], [0], [1], [0, 0, 1, 1], [], []>} : vector<4x32xbf16>, vector<32x32xbf16>, vector<4x32xf32> -> vector<4x32xf32>
    %c0_68 = arith.constant 0 : index
    %c0_69 = arith.constant 0 : index
    %208 = vector.load %arg8[%c0_68, %c0_69] : memref<1x32xf32, #tpu.memory_space<vmem>>, vector<1x32xf32>
    %209 = vector.broadcast %208 : vector<1x32xf32> to vector<4x32xf32>
    %210 = arith.addf %207, %209 : vector<4x32xf32>
    %cst_70 = arith.constant 5.000000e-01 : f32
    %211 = vector.broadcast %cst_70 : f32 to vector<4x32xf32>
    %212 = arith.mulf %211, %210 : vector<4x32xf32>
    %cst_71 = arith.constant 0.707106769 : f32
    %213 = vector.broadcast %cst_71 : f32 to vector<4x32xf32>
    %214 = arith.mulf %210, %213 : vector<4x32xf32>
    %cst_72 = arith.constant 0.000000e+00 : f32
    %215 = vector.broadcast %cst_72 : f32 to vector<4x32xf32>
    %216 = arith.cmpf oge, %214, %215 : vector<4x32xf32>
    %cst_73 = arith.constant 1.000000e+00 : f32
    %cst_74 = arith.constant -1.000000e+00 : f32
    %217 = vector.broadcast %cst_73 : f32 to vector<4x32xf32>
    %218 = vector.broadcast %cst_74 : f32 to vector<4x32xf32>
    %219 = arith.select %216, %217, %218 : vector<4x32xi1>, vector<4x32xf32>
    %220 = math.absf %214 : vector<4x32xf32>
    %cst_75 = arith.constant 0.327591091 : f32
    %221 = vector.broadcast %cst_75 : f32 to vector<4x32xf32>
    %222 = arith.mulf %221, %220 : vector<4x32xf32>
    %cst_76 = arith.constant 1.000000e+00 : f32
    %223 = vector.broadcast %cst_76 : f32 to vector<4x32xf32>
    %224 = arith.addf %223, %222 : vector<4x32xf32>
    %cst_77 = arith.constant 1.000000e+00 : f32
    %225 = vector.broadcast %cst_77 : f32 to vector<4x32xf32>
    %226 = arith.divf %225, %224 : vector<4x32xf32>
    %cst_78 = arith.constant 1.06140542 : f32
    %227 = vector.broadcast %cst_78 : f32 to vector<4x32xf32>
    %228 = arith.mulf %227, %226 : vector<4x32xf32>
    %cst_79 = arith.constant -1.45315206 : f32
    %229 = vector.broadcast %cst_79 : f32 to vector<4x32xf32>
    %230 = arith.addf %228, %229 : vector<4x32xf32>
    %231 = arith.mulf %230, %226 : vector<4x32xf32>
    %cst_80 = arith.constant 1.42141378 : f32
    %232 = vector.broadcast %cst_80 : f32 to vector<4x32xf32>
    %233 = arith.addf %231, %232 : vector<4x32xf32>
    %234 = arith.mulf %233, %226 : vector<4x32xf32>
    %cst_81 = arith.constant -0.284496725 : f32
    %235 = vector.broadcast %cst_81 : f32 to vector<4x32xf32>
    %236 = arith.addf %234, %235 : vector<4x32xf32>
    %237 = arith.mulf %236, %226 : vector<4x32xf32>
    %cst_82 = arith.constant 0.254829586 : f32
    %238 = vector.broadcast %cst_82 : f32 to vector<4x32xf32>
    %239 = arith.addf %237, %238 : vector<4x32xf32>
    %240 = arith.mulf %239, %226 : vector<4x32xf32>
    %cst_83 = arith.constant 0.000000e+00 : f32
    %241 = vector.broadcast %cst_83 : f32 to vector<4x32xf32>
    %242 = arith.subf %241, %220 : vector<4x32xf32>
    %243 = arith.mulf %242, %220 : vector<4x32xf32>
    %244 = math.exp %243 : vector<4x32xf32>
    %245 = arith.mulf %240, %244 : vector<4x32xf32>
    %cst_84 = arith.constant 1.000000e+00 : f32
    %246 = vector.broadcast %cst_84 : f32 to vector<4x32xf32>
    %247 = arith.subf %246, %245 : vector<4x32xf32>
    %248 = arith.mulf %219, %247 : vector<4x32xf32>
    %cst_85 = arith.constant 1.000000e+00 : f32
    %249 = vector.broadcast %cst_85 : f32 to vector<4x32xf32>
    %250 = arith.addf %249, %248 : vector<4x32xf32>
    %251 = arith.mulf %212, %250 : vector<4x32xf32>
    %c0_86 = arith.constant 0 : index
    %c0_87 = arith.constant 0 : index
    %252 = vector.load %arg9[%c0_86, %c0_87] : memref<1x32xf32, #tpu.memory_space<vmem>>, vector<1x32xf32>
    %253 = vector.broadcast %252 : vector<1x32xf32> to vector<4x32xf32>
    %254 = arith.mulf %251, %253 : vector<4x32xf32>
    %c0_88 = arith.constant 0 : index
    %c0_89 = arith.constant 0 : index
    %255 = vector.load %arg10[%c0_88, %c0_89] : memref<1x32xf32, #tpu.memory_space<vmem>>, vector<1x32xf32>
    %256 = vector.broadcast %255 : vector<1x32xf32> to vector<4x32xf32>
    %257 = arith.addf %254, %256 : vector<4x32xf32>
    %258 = arith.truncf %257 : vector<4x32xf32> to vector<4x32xbf16>
    %c0_90 = arith.constant 0 : index
    %c1 = arith.constant 1 : index
    %c0_91 = arith.constant 0 : index
    %c0_92 = arith.constant 0 : index
    %259 = vector.load %arg11[%c0_90, %c1, %c0_91, %c0_92] : memref<1x4x4x32xbf16, #tpu.memory_space<vmem>>, vector<1x1x4x32xbf16>
    %260 = vector.shape_cast %259 : vector<1x1x4x32xbf16> to vector<4x32xbf16>
    %261 = vector.shape_cast %258 : vector<4x32xbf16> to vector<1x1x4x32xbf16>
    tpu.vector_store %arg11[%c0_90, %c1, %c0_91, %c0_92], %261 {strides = array<i32>} : memref<1x4x4x32xbf16, #tpu.memory_space<vmem>>, vector<1x1x4x32xbf16>,
    %262 = vector.extract_strided_slice %144 {offsets = [2, 0, 0], sizes = [1, 4, 32], strides = [1, 1, 1]} : vector<4x4x32xf32> to vector<1x4x32xf32>
    %263 = vector.shape_cast %262 : vector<1x4x32xf32> to vector<4x32xf32>
    %264 = arith.truncf %263 : vector<4x32xf32> to vector<4x32xbf16>
    %cst_93 = arith.constant dense<0.000000e+00> : vector<4x32xf32>
    %265 = tpu.matmul %264, %145, %cst_93 {dimension_numbers = #tpu.dot_dimension_numbers<[1], [0], [0], [1], [0, 0, 1, 1], [], []>} : vector<4x32xbf16>, vector<32x32xbf16>, vector<4x32xf32> -> vector<4x32xf32>
    %c0_94 = arith.constant 0 : index
    %c0_95 = arith.constant 0 : index
    %266 = vector.load %arg8[%c0_94, %c0_95] : memref<1x32xf32, #tpu.memory_space<vmem>>, vector<1x32xf32>
    %267 = vector.broadcast %266 : vector<1x32xf32> to vector<4x32xf32>
    %268 = arith.addf %265, %267 : vector<4x32xf32>
    %cst_96 = arith.constant 5.000000e-01 : f32
    %269 = vector.broadcast %cst_96 : f32 to vector<4x32xf32>
    %270 = arith.mulf %269, %268 : vector<4x32xf32>
    %cst_97 = arith.constant 0.707106769 : f32
    %271 = vector.broadcast %cst_97 : f32 to vector<4x32xf32>
    %272 = arith.mulf %268, %271 : vector<4x32xf32>
    %cst_98 = arith.constant 0.000000e+00 : f32
    %273 = vector.broadcast %cst_98 : f32 to vector<4x32xf32>
    %274 = arith.cmpf oge, %272, %273 : vector<4x32xf32>
    %cst_99 = arith.constant 1.000000e+00 : f32
    %cst_100 = arith.constant -1.000000e+00 : f32
    %275 = vector.broadcast %cst_99 : f32 to vector<4x32xf32>
    %276 = vector.broadcast %cst_100 : f32 to vector<4x32xf32>
    %277 = arith.select %274, %275, %276 : vector<4x32xi1>, vector<4x32xf32>
    %278 = math.absf %272 : vector<4x32xf32>
    %cst_101 = arith.constant 0.327591091 : f32
    %279 = vector.broadcast %cst_101 : f32 to vector<4x32xf32>
    %280 = arith.mulf %279, %278 : vector<4x32xf32>
    %cst_102 = arith.constant 1.000000e+00 : f32
    %281 = vector.broadcast %cst_102 : f32 to vector<4x32xf32>
    %282 = arith.addf %281, %280 : vector<4x32xf32>
    %cst_103 = arith.constant 1.000000e+00 : f32
    %283 = vector.broadcast %cst_103 : f32 to vector<4x32xf32>
    %284 = arith.divf %283, %282 : vector<4x32xf32>
    %cst_104 = arith.constant 1.06140542 : f32
    %285 = vector.broadcast %cst_104 : f32 to vector<4x32xf32>
    %286 = arith.mulf %285, %284 : vector<4x32xf32>
    %cst_105 = arith.constant -1.45315206 : f32
    %287 = vector.broadcast %cst_105 : f32 to vector<4x32xf32>
    %288 = arith.addf %286, %287 : vector<4x32xf32>
    %289 = arith.mulf %288, %284 : vector<4x32xf32>
    %cst_106 = arith.constant 1.42141378 : f32
    %290 = vector.broadcast %cst_106 : f32 to vector<4x32xf32>
    %291 = arith.addf %289, %290 : vector<4x32xf32>
    %292 = arith.mulf %291, %284 : vector<4x32xf32>
    %cst_107 = arith.constant -0.284496725 : f32
    %293 = vector.broadcast %cst_107 : f32 to vector<4x32xf32>
    %294 = arith.addf %292, %293 : vector<4x32xf32>
    %295 = arith.mulf %294, %284 : vector<4x32xf32>
    %cst_108 = arith.constant 0.254829586 : f32
    %296 = vector.broadcast %cst_108 : f32 to vector<4x32xf32>
    %297 = arith.addf %295, %296 : vector<4x32xf32>
    %298 = arith.mulf %297, %284 : vector<4x32xf32>
    %cst_109 = arith.constant 0.000000e+00 : f32
    %299 = vector.broadcast %cst_109 : f32 to vector<4x32xf32>
    %300 = arith.subf %299, %278 : vector<4x32xf32>
    %301 = arith.mulf %300, %278 : vector<4x32xf32>
    %302 = math.exp %301 : vector<4x32xf32>
    %303 = arith.mulf %298, %302 : vector<4x32xf32>
    %cst_110 = arith.constant 1.000000e+00 : f32
    %304 = vector.broadcast %cst_110 : f32 to vector<4x32xf32>
    %305 = arith.subf %304, %303 : vector<4x32xf32>
    %306 = arith.mulf %277, %305 : vector<4x32xf32>
    %cst_111 = arith.constant 1.000000e+00 : f32
    %307 = vector.broadcast %cst_111 : f32 to vector<4x32xf32>
    %308 = arith.addf %307, %306 : vector<4x32xf32>
    %309 = arith.mulf %270, %308 : vector<4x32xf32>
    %c0_112 = arith.constant 0 : index
    %c0_113 = arith.constant 0 : index
    %310 = vector.load %arg9[%c0_112, %c0_113] : memref<1x32xf32, #tpu.memory_space<vmem>>, vector<1x32xf32>
    %311 = vector.broadcast %310 : vector<1x32xf32> to vector<4x32xf32>
    %312 = arith.mulf %309, %311 : vector<4x32xf32>
    %c0_114 = arith.constant 0 : index
    %c0_115 = arith.constant 0 : index
    %313 = vector.load %arg10[%c0_114, %c0_115] : memref<1x32xf32, #tpu.memory_space<vmem>>, vector<1x32xf32>
    %314 = vector.broadcast %313 : vector<1x32xf32> to vector<4x32xf32>
    %315 = arith.addf %312, %314 : vector<4x32xf32>
    %316 = arith.truncf %315 : vector<4x32xf32> to vector<4x32xbf16>
    %c0_116 = arith.constant 0 : index
    %c2 = arith.constant 2 : index
    %c0_117 = arith.constant 0 : index
    %c0_118 = arith.constant 0 : index
    %317 = vector.load %arg11[%c0_116, %c2, %c0_117, %c0_118] : memref<1x4x4x32xbf16, #tpu.memory_space<vmem>>, vector<1x1x4x32xbf16>
    %318 = vector.shape_cast %317 : vector<1x1x4x32xbf16> to vector<4x32xbf16>
    %319 = vector.shape_cast %316 : vector<4x32xbf16> to vector<1x1x4x32xbf16>
    tpu.vector_store %arg11[%c0_116, %c2, %c0_117, %c0_118], %319 {strides = array<i32>} : memref<1x4x4x32xbf16, #tpu.memory_space<vmem>>, vector<1x1x4x32xbf16>,
    %320 = vector.extract_strided_slice %144 {offsets = [3, 0, 0], sizes = [1, 4, 32], strides = [1, 1, 1]} : vector<4x4x32xf32> to vector<1x4x32xf32>
    %321 = vector.shape_cast %320 : vector<1x4x32xf32> to vector<4x32xf32>
    %322 = arith.truncf %321 : vector<4x32xf32> to vector<4x32xbf16>
    %cst_119 = arith.constant dense<0.000000e+00> : vector<4x32xf32>
    %323 = tpu.matmul %322, %145, %cst_119 {dimension_numbers = #tpu.dot_dimension_numbers<[1], [0], [0], [1], [0, 0, 1, 1], [], []>} : vector<4x32xbf16>, vector<32x32xbf16>, vector<4x32xf32> -> vector<4x32xf32>
    %c0_120 = arith.constant 0 : index
    %c0_121 = arith.constant 0 : index
    %324 = vector.load %arg8[%c0_120, %c0_121] : memref<1x32xf32, #tpu.memory_space<vmem>>, vector<1x32xf32>
    %325 = vector.broadcast %324 : vector<1x32xf32> to vector<4x32xf32>
    %326 = arith.addf %323, %325 : vector<4x32xf32>
    %cst_122 = arith.constant 5.000000e-01 : f32
    %327 = vector.broadcast %cst_122 : f32 to vector<4x32xf32>
    %328 = arith.mulf %327, %326 : vector<4x32xf32>
    %cst_123 = arith.constant 0.707106769 : f32
    %329 = vector.broadcast %cst_123 : f32 to vector<4x32xf32>
    %330 = arith.mulf %326, %329 : vector<4x32xf32>
    %cst_124 = arith.constant 0.000000e+00 : f32
    %331 = vector.broadcast %cst_124 : f32 to vector<4x32xf32>
    %332 = arith.cmpf oge, %330, %331 : vector<4x32xf32>
    %cst_125 = arith.constant 1.000000e+00 : f32
    %cst_126 = arith.constant -1.000000e+00 : f32
    %333 = vector.broadcast %cst_125 : f32 to vector<4x32xf32>
    %334 = vector.broadcast %cst_126 : f32 to vector<4x32xf32>
    %335 = arith.select %332, %333, %334 : vector<4x32xi1>, vector<4x32xf32>
    %336 = math.absf %330 : vector<4x32xf32>
    %cst_127 = arith.constant 0.327591091 : f32
    %337 = vector.broadcast %cst_127 : f32 to vector<4x32xf32>
    %338 = arith.mulf %337, %336 : vector<4x32xf32>
    %cst_128 = arith.constant 1.000000e+00 : f32
    %339 = vector.broadcast %cst_128 : f32 to vector<4x32xf32>
    %340 = arith.addf %339, %338 : vector<4x32xf32>
    %cst_129 = arith.constant 1.000000e+00 : f32
    %341 = vector.broadcast %cst_129 : f32 to vector<4x32xf32>
    %342 = arith.divf %341, %340 : vector<4x32xf32>
    %cst_130 = arith.constant 1.06140542 : f32
    %343 = vector.broadcast %cst_130 : f32 to vector<4x32xf32>
    %344 = arith.mulf %343, %342 : vector<4x32xf32>
    %cst_131 = arith.constant -1.45315206 : f32
    %345 = vector.broadcast %cst_131 : f32 to vector<4x32xf32>
    %346 = arith.addf %344, %345 : vector<4x32xf32>
    %347 = arith.mulf %346, %342 : vector<4x32xf32>
    %cst_132 = arith.constant 1.42141378 : f32
    %348 = vector.broadcast %cst_132 : f32 to vector<4x32xf32>
    %349 = arith.addf %347, %348 : vector<4x32xf32>
    %350 = arith.mulf %349, %342 : vector<4x32xf32>
    %cst_133 = arith.constant -0.284496725 : f32
    %351 = vector.broadcast %cst_133 : f32 to vector<4x32xf32>
    %352 = arith.addf %350, %351 : vector<4x32xf32>
    %353 = arith.mulf %352, %342 : vector<4x32xf32>
    %cst_134 = arith.constant 0.254829586 : f32
    %354 = vector.broadcast %cst_134 : f32 to vector<4x32xf32>
    %355 = arith.addf %353, %354 : vector<4x32xf32>
    %356 = arith.mulf %355, %342 : vector<4x32xf32>
    %cst_135 = arith.constant 0.000000e+00 : f32
    %357 = vector.broadcast %cst_135 : f32 to vector<4x32xf32>
    %358 = arith.subf %357, %336 : vector<4x32xf32>
    %359 = arith.mulf %358, %336 : vector<4x32xf32>
    %360 = math.exp %359 : vector<4x32xf32>
    %361 = arith.mulf %356, %360 : vector<4x32xf32>
    %cst_136 = arith.constant 1.000000e+00 : f32
    %362 = vector.broadcast %cst_136 : f32 to vector<4x32xf32>
    %363 = arith.subf %362, %361 : vector<4x32xf32>
    %364 = arith.mulf %335, %363 : vector<4x32xf32>
    %cst_137 = arith.constant 1.000000e+00 : f32
    %365 = vector.broadcast %cst_137 : f32 to vector<4x32xf32>
    %366 = arith.addf %365, %364 : vector<4x32xf32>
    %367 = arith.mulf %328, %366 : vector<4x32xf32>
    %c0_138 = arith.constant 0 : index
    %c0_139 = arith.constant 0 : index
    %368 = vector.load %arg9[%c0_138, %c0_139] : memref<1x32xf32, #tpu.memory_space<vmem>>, vector<1x32xf32>
    %369 = vector.broadcast %368 : vector<1x32xf32> to vector<4x32xf32>
    %370 = arith.mulf %367, %369 : vector<4x32xf32>
    %c0_140 = arith.constant 0 : index
    %c0_141 = arith.constant 0 : index
    %371 = vector.load %arg10[%c0_140, %c0_141] : memref<1x32xf32, #tpu.memory_space<vmem>>, vector<1x32xf32>
    %372 = vector.broadcast %371 : vector<1x32xf32> to vector<4x32xf32>
    %373 = arith.addf %370, %372 : vector<4x32xf32>
    %374 = arith.truncf %373 : vector<4x32xf32> to vector<4x32xbf16>
    %c0_142 = arith.constant 0 : index
    %c3 = arith.constant 3 : index
    %c0_143 = arith.constant 0 : index
    %c0_144 = arith.constant 0 : index
    %375 = vector.load %arg11[%c0_142, %c3, %c0_143, %c0_144] : memref<1x4x4x32xbf16, #tpu.memory_space<vmem>>, vector<1x1x4x32xbf16>
    %376 = vector.shape_cast %375 : vector<1x1x4x32xbf16> to vector<4x32xbf16>
    %377 = vector.shape_cast %374 : vector<4x32xbf16> to vector<1x1x4x32xbf16>
    tpu.vector_store %arg11[%c0_142, %c3, %c0_143, %c0_144], %377 {strides = array<i32>} : memref<1x4x4x32xbf16, #tpu.memory_space<vmem>>, vector<1x1x4x32xbf16>,
    return
  }
  func.func @transform_0(%arg0: i32, %arg1: i32) -> (i32, i32, i32, i32) {
    %c0_i32 = arith.constant 0 : i32
    %c0_i32_0 = arith.constant 0 : i32
    %c0_i32_1 = arith.constant 0 : i32
    %c0_i32_2 = arith.constant 0 : i32
    return %arg0, %c0_i32, %c0_i32_0, %c0_i32_1 : i32, i32, i32, i32
  }
  func.func @transform_1(%arg0: i32, %arg1: i32) -> (i32, i32, i32) {
    %c0_i32 = arith.constant 0 : i32
    %c0_i32_0 = arith.constant 0 : i32
    %c0_i32_1 = arith.constant 0 : i32
    %c0_i32_2 = arith.constant 0 : i32
    return %c0_i32, %c0_i32_0, %c0_i32_1 : i32, i32, i32
  }
  func.func @transform_2(%arg0: i32, %arg1: i32) -> (i32, i32) {
    %c0_i32 = arith.constant 0 : i32
    %c0_i32_0 = arith.constant 0 : i32
    %c0_i32_1 = arith.constant 0 : i32
    return %c0_i32, %c0_i32_0 : i32, i32
  }
  func.func @transform_3(%arg0: i32, %arg1: i32) -> (i32, i32) {
    %c0_i32 = arith.constant 0 : i32
    %c0_i32_0 = arith.constant 0 : i32
    %c0_i32_1 = arith.constant 0 : i32
    return %c0_i32, %c0_i32_0 : i32, i32
  }
  func.func @transform_4(%arg0: i32, %arg1: i32) -> (i32, i32) {
    %c0_i32 = arith.constant 0 : i32
    %c0_i32_0 = arith.constant 0 : i32
    %c0_i32_1 = arith.constant 0 : i32
    return %c0_i32, %c0_i32_0 : i32, i32
  }
  func.func @transform_5(%arg0: i32, %arg1: i32) -> (i32, i32) {
    %c0_i32 = arith.constant 0 : i32
    %c0_i32_0 = arith.constant 0 : i32
    %c0_i32_1 = arith.constant 0 : i32
    return %c0_i32, %c0_i32_0 : i32, i32
  }
  func.func @transform_6(%arg0: i32, %arg1: i32) -> (i32, i32) {
    %c0_i32 = arith.constant 0 : i32
    %c0_i32_0 = arith.constant 0 : i32
    %c0_i32_1 = arith.constant 0 : i32
    return %c0_i32, %c0_i32_0 : i32, i32
  }
  func.func @transform_7(%arg0: i32, %arg1: i32) -> (i32, i32) {
    %c0_i32 = arith.constant 0 : i32
    %c0_i32_0 = arith.constant 0 : i32
    %c0_i32_1 = arith.constant 0 : i32
    return %c0_i32, %c0_i32_0 : i32, i32
  }
  func.func @transform_8(%arg0: i32, %arg1: i32) -> (i32, i32) {
    %c0_i32 = arith.constant 0 : i32
    %c0_i32_0 = arith.constant 0 : i32
    %c0_i32_1 = arith.constant 0 : i32
    return %c0_i32, %c0_i32_0 : i32, i32
  }
  func.func @transform_9(%arg0: i32, %arg1: i32) -> (i32, i32, i32, i32) {
    %c0_i32 = arith.constant 0 : i32
    %c0_i32_0 = arith.constant 0 : i32
    %c0_i32_1 = arith.constant 0 : i32
    return %arg0, %arg1, %c0_i32, %c0_i32_0 : i32, i32, i32, i32
  }
}

module attributes {stable_mosaic.version = 11 : i64} {
  func.func @_pool_head_kernel(%arg0: i32, %arg1: memref<2x16x32xbf16, #tpu.memory_space<vmem>>, %arg2: memref<32x128xbf16, #tpu.memory_space<vmem>>, %arg3: memref<1x128xf32, #tpu.memory_space<vmem>>, %arg4: memref<2x128xf32, #tpu.memory_space<vmem>>) attributes {dimension_semantics = [#tpu.dimension_semantics<parallel>], iteration_bounds = array<i64: 1>, scalar_prefetch = 0 : i64, scratch_operands = 0 : i64, tpu.core_type = #tpu.core_type<tc>, window_params = [{transform_indices = @transform_0, window_bounds = array<i64: 2, 16, 32>}, {pipeline_mode = #tpu.pipeline_mode<synchronous>, transform_indices = @transform_1, window_bounds = array<i64: 32, 128>}, {pipeline_mode = #tpu.pipeline_mode<synchronous>, transform_indices = @transform_2, window_bounds = array<i64: 1, 128>}, {transform_indices = @transform_3, window_bounds = array<i64: 2, 128>}]} {
    %c0 = arith.constant 0 : index
    %c0_0 = arith.constant 0 : index
    %c0_1 = arith.constant 0 : index
    %0 = vector.load %arg1[%c0, %c0_0, %c0_1] : memref<2x16x32xbf16, #tpu.memory_space<vmem>>, vector<2x16x32xbf16>
    %1 = arith.extf %0 : vector<2x16x32xbf16> to vector<2x16x32xf32>
    %cst = arith.constant dense<0.000000e+00> : vector<2x32xf32>
    %2 = vector.multi_reduction <add>, %1, %cst [1] : vector<2x16x32xf32> to vector<2x32xf32>
    %cst_2 = arith.constant 1.600000e+01 : f32
    %3 = vector.broadcast %cst_2 : f32 to vector<2x32xf32>
    %4 = arith.divf %2, %3 : vector<2x32xf32>
    %5 = arith.truncf %4 : vector<2x32xf32> to vector<2x32xbf16>
    %c0_3 = arith.constant 0 : index
    %c0_4 = arith.constant 0 : index
    %6 = vector.load %arg2[%c0_3, %c0_4] : memref<32x128xbf16, #tpu.memory_space<vmem>>, vector<32x128xbf16>
    %cst_5 = arith.constant dense<0.000000e+00> : vector<2x128xf32>
    %7 = tpu.matmul %5, %6, %cst_5 {dimension_numbers = #tpu.dot_dimension_numbers<[1], [0], [0], [1], [0, 0, 1, 1], [], []>} : vector<2x32xbf16>, vector<32x128xbf16>, vector<2x128xf32> -> vector<2x128xf32>
    %c0_6 = arith.constant 0 : index
    %c0_7 = arith.constant 0 : index
    %8 = vector.load %arg3[%c0_6, %c0_7] : memref<1x128xf32, #tpu.memory_space<vmem>>, vector<1x128xf32>
    %9 = vector.broadcast %8 : vector<1x128xf32> to vector<2x128xf32>
    %10 = arith.addf %7, %9 : vector<2x128xf32>
    %c0_8 = arith.constant 0 : index
    %c0_9 = arith.constant 0 : index
    %11 = vector.load %arg4[%c0_8, %c0_9] : memref<2x128xf32, #tpu.memory_space<vmem>>, vector<2x128xf32>
    tpu.vector_store %arg4[%c0_8, %c0_9], %10 {strides = array<i32>} : memref<2x128xf32, #tpu.memory_space<vmem>>, vector<2x128xf32>,
    return
  }
  func.func @transform_0(%arg0: i32) -> (i32, i32, i32) {
    %c0_i32 = arith.constant 0 : i32
    %c0_i32_0 = arith.constant 0 : i32
    %c0_i32_1 = arith.constant 0 : i32
    return %arg0, %c0_i32, %c0_i32_0 : i32, i32, i32
  }
  func.func @transform_1(%arg0: i32) -> (i32, i32) {
    %c0_i32 = arith.constant 0 : i32
    %c0_i32_0 = arith.constant 0 : i32
    %c0_i32_1 = arith.constant 0 : i32
    return %c0_i32, %c0_i32_0 : i32, i32
  }
  func.func @transform_2(%arg0: i32) -> (i32, i32) {
    %c0_i32 = arith.constant 0 : i32
    %c0_i32_0 = arith.constant 0 : i32
    %c0_i32_1 = arith.constant 0 : i32
    return %c0_i32, %c0_i32_0 : i32, i32
  }
  func.func @transform_3(%arg0: i32) -> (i32, i32) {
    %c0_i32 = arith.constant 0 : i32
    %c0_i32_0 = arith.constant 0 : i32
    return %arg0, %c0_i32 : i32, i32
  }
}

</mosaic_0001>

<bundles_post_ra>
// kernel: convmixer_forward.4
= control target key start
LH: loop header
LB: loop body
LE: loop exit
PB: predicated region body
PF: predicated region fallthrough
CT: control target
= control target key end

     0   :  { %vm375_vm4 = vcmask 257024   ;;  %s642_s1 = inlined_call_operand.vmem [shape: bf16[256,32], index: 1, kind: input, shape index: {}]   ;;  %s643_s0 = inlined_call_operand.vmem [shape: bf16[32,256], index: 0, kind: input, shape index: {}]   ;;  %s644_s2 = inlined_call_operand.vmem [shape: f32[1,32], index: 2, kind: input, shape index: {}]   ;;  %s645_s3 = inlined_call_operand.vmem [shape: f32[1,32], index: 3, kind: input, shape index: {}]   ;;  %s646_s4 = inlined_call_operand.vmem [shape: f32[1,32], index: 4, kind: input, shape index: {}]   ;;  %s647_s5 = inlined_call_operand.vmem [shape: bf16[32,32], index: 5, kind: output, shape index: {}]  }
   0x1   :  { %v460_v0 = vld [vmem:[%s642_s1 + $0x78] sm:$0xff]   ;;  %v462_v2 = vld [vmem:[%s642_s1 + $0x70] sm:$0xff]   ;;  %v464_v4 = vld [vmem:[%s642_s1 + $0x68] sm:$0xff]  }
   0x2   :  { %v461_v1 = vld [vmem:[%s642_s1 + $0x38] sm:$0xff]   ;;  %415 = vmatprep.subr.bf16.mxu0 %v460_v0  ;;  %443 = vmatprep.subr.bf16.mxu1 %v460_v0  ;;  %v463_v3 = vld [vmem:[%s642_s1 + $0x30] sm:$0xff]   ;;  %v465_v5 = vld [vmem:[%s642_s1 + $0x28] sm:$0xff]  }
   0x3   :  { %416 = vmatpush3.bf16.msra.mxu0 %v461_v1  ;;  %451 = vmatpush3.bf16.msra.mxu1 %v461_v1  ;;  %v466_v6 = vld [vmem:[%s642_s1 + $0x60] sm:$0xff]   ;;  %v468_v8 = vld [vmem:[%s642_s1 + $0x58] sm:$0xff]   ;;  %v470_v10 = vld [vmem:[%s642_s1 + $0x50] sm:$0xff]  }
   0x4   :  { %417 = vmatprep.subr.bf16.mxu0 %v462_v2  ;;  %444 = vmatprep.subr.bf16.mxu1 %v462_v2  ;;  %v467_v7 = vld [vmem:[%s642_s1 + $0x20] sm:$0xff]   ;;  %v469_v9 = vld [vmem:[%s642_s1 + $0x18] sm:$0xff]   ;;  %v471_v13 = vld [vmem:[%s642_s1 + $0x10] sm:$0xff]  }
   0x5   :  { %v478_v11 = vld [vmem:[%s643_s0 + $0x4] ss:$8 sps:$4 sm:$0xff]   ;;  %v481_v12 = vld [vmem:[%s643_s0 + $0x14] ss:$8 sps:$4 sm:$0xff]   ;;  %v476_v18 = vld [vmem:[%s643_s0] ss:$8 sps:$4 sm:$0xff]  }
   0x6   :  { %v472_v14 = vld [vmem:[%s642_s1 + $0x48] sm:$0xff]   ;;  %212 = vmatprep.mubr.bf16.mxu0 %v478_v11  ;;  %220 = vmatprep.mubr.bf16.mxu1 %v481_v12  ;;  %v474_v16 = vld [vmem:[%s642_s1 + $0x40] sm:$0xff]   ;;  %v479_v19 = vld [vmem:[%s643_s0 + $0x10] ss:$8 sps:$4 sm:$0xff]  }
   0x7   :  { %418 = vmatpush3.bf16.msra.mxu0 %v463_v3  ;;  %452 = vmatpush3.bf16.msra.mxu1 %v463_v3  ;;  %v473_v15 = vld [vmem:[%s642_s1 + $0x8] sm:$0xff]   ;;  %v475_v17 = vld [vmem:[%s642_s1] sm:$0xff]  }
   0x8   :  { %419 = vmatprep.subr.bf16.mxu0 %v464_v4  ;;  %445 = vmatprep.subr.bf16.mxu1 %v464_v4  ;;  %v384_v22 = vld [vmem:[%s644_s2] ss:$0 sm:$0xff] }
   0xb   :  { %420 = vmatpush3.bf16.msra.mxu0 %v465_v5  ;;  %453 = vmatpush3.bf16.msra.mxu1 %v465_v5 }
   0xc   :  { %421 = vmatprep.subr.bf16.mxu0 %v466_v6  ;;  %446 = vmatprep.subr.bf16.mxu1 %v466_v6 }
   0xf   :  { %422 = vmatpush3.bf16.msra.mxu0 %v467_v7  ;;  %454 = vmatpush3.bf16.msra.mxu1 %v467_v7 }
  0x10   :  { %423 = vmatprep.subr.bf16.mxu0 %v468_v8  ;;  %447 = vmatprep.subr.bf16.mxu1 %v468_v8 }
  0x13   :  { %424 = vmatpush3.bf16.msra.mxu0 %v469_v9  ;;  %455 = vmatpush3.bf16.msra.mxu1 %v469_v9 }
  0x14   :  { %425 = vmatprep.subr.bf16.mxu0 %v470_v10  ;;  %448 = vmatprep.subr.bf16.mxu1 %v470_v10 }
  0x17   :  { %426 = vmatpush3.bf16.msra.mxu0 %v471_v13  ;;  %456 = vmatpush3.bf16.msra.mxu1 %v471_v13 }
  0x18   :  { %427 = vmatprep.subr.bf16.mxu0 %v472_v14  ;;  %449 = vmatprep.subr.bf16.mxu1 %v472_v14 }
  0x1b   :  { %428 = vmatpush3.bf16.msra.mxu0 %v473_v15  ;;  %457 = vmatpush3.bf16.msra.mxu1 %v473_v15 }
  0x1c   :  { %429 = vmatprep.subr.bf16.mxu0 %v474_v16  ;;  %450 = vmatprep.subr.bf16.mxu1 %v474_v16 }
  0x1f   :  { %430 = vmatpush3.bf16.msra.mxu0 %v475_v17  ;;  %458 = vmatpush3.bf16.msra.mxu1 %v475_v17 }
  0x22   :  { %213 = vmatmul.mubr.bf16.vlgmr.msra.gmra.mxu0 %v476_v18  ;;  %221 = vmatmul.mubr.bf16.vlgmr.msra.gmra.mxu1 %v479_v19 }
  0xe2   :  { %v431_v20 = vpop.f32.mrf.mxu0  ;;  %v437_v21 = vpop.f32.mrf.mxu1 }
  0xe4   :  { %v432_v23 = vpop.f32.mrf.mxu0  ;;  %v438_v24 = vpop.f32.mrf.mxu1 }
  0xe5   :  { %v433_v25 = vadd.f32 %v432_v23, %v431_v20  ;;  %v439_v26 = vadd.f32 %v438_v24, %v437_v21 }
  0xe6   :  { %v434_v27 = vpop.f32.mrf.mxu0  ;;  %v440_v28 = vpop.f32.mrf.mxu1 }
  0xe7   :  { %v592_v29 = vadd.f32 %v433_v25, %v384_v22  ;;  %v594_v30 = vadd.f32 %v439_v26, %v384_v22 }
  0xe8   :  { %v435_v31 = vpop.f32.mrf.mxu0  ;;  %v441_v32 = vpop.f32.mrf.mxu1 }
  0xe9   :  { %v597_v33 = vmul.f32 0.70710677, %v592_v29  ;;  %v600_v34 = vmul.f32 0.70710677, %v594_v30  ;;  %v436_v35 = vadd.f32 %v435_v31, %v434_v27  ;;  %v442_v36 = vadd.f32 %v441_v32, %v440_v28 }
  0xeb   :  { %v245_v37 = vand.u32 2147483647, %v597_v33  ;;  %v247_v38 = vand.u32 2147483647, %v600_v34  ;;  %v604_v39 = vadd.f32 %v436_v35, %v384_v22  ;;  %v606_v40 = vadd.f32 %v442_v36, %v384_v22 }
  0xec   :  { %vm237_vm0 = vcmp.ge.f32.partialorder %v597_v33, 0.0  ;;  %vm239_vm1 = vcmp.ge.f32.partialorder %v600_v34, 0.0 }
  0xed   :  { %v249_v41 = vmul.f32 0.3275911, %v245_v37  ;;  %v251_v42 = vmul.f32 0.3275911, %v247_v38  ;;  %v609_v43 = vmul.f32 0.70710677, %v604_v39 }
  0xee   :  { %v612_v44 = vmul.f32 0.70710677, %v606_v40  ;;  %v301_v53 = vsub.f32 0.0, %v245_v37  ;;  %v303_v54 = vsub.f32 0.0, %v247_v38 }
  0xef   :  { %v253_v45 = vadd.f32 1.0, %v249_v41  ;;  %v255_v46 = vadd.f32 1.0, %v251_v42  ;;  %v246_v47 = vand.u32 2147483647, %v609_v43  ;;  %vm238_vm2 = vcmp.ge.f32.partialorder %v609_v43, 0.0 }
  0xf0   :  { %v248_v48 = vand.u32 2147483647, %v612_v44  ;;  %v305_v55 = vmul.f32 %v301_v53, %v245_v37  ;;  %v307_v56 = vmul.f32 %v303_v54, %v247_v38  ;;  %vm240_vm3 = vcmp.ge.f32.partialorder %v612_v44, 0.0  ;;  %v406_v43 = vld [vmem:[%s646_s4] ss:$0 sm:$0xff] }
  0xf1   :  { %482 = vrcp.f32 %v253_v45  ;;  %v250_v49 = vmul.f32 0.3275911, %v246_v47  ;;  %v302_v57 = vsub.f32 0.0, %v246_v47 }
  0xf2   :  { %484 = vrcp.f32 %v255_v46  ;;  %v252_v50 = vmul.f32 0.3275911, %v248_v48  ;;  %v304_v58 = vsub.f32 0.0, %v248_v48  ;;  %v309_v62 = vmul.f32 1.442695, %v305_v55 }
  0xf3   :  { %v254_v51 = vadd.f32 1.0, %v250_v49  ;;  %v313_v0 = vmul.f32 1.442695, %v307_v56  ;;  %v306_v1 = vmul.f32 %v302_v57, %v246_v47 }
  0xf4   :  { %v256_v52 = vadd.f32 1.0, %v252_v50  ;;  %v308_v3 = vmul.f32 %v304_v58, %v248_v48 }
  0xf5   :  { %486 = vrcp.f32 %v254_v51  ;;  %v311_v10 = vmul.f32 1.442695, %v306_v1  ;;  %v231_v1 = vmul.f32 0.5, %v594_v30  ;;  %v232_v30 = vmul.f32 0.5, %v606_v40 }
  0xf6   :  { %488 = vrcp.f32 %v256_v52  ;;  %v315_v13 = vmul.f32 1.442695, %v308_v3  ;;  %v498_v52 = vmov -1.0  }
  0xf7   :  { %490 = vpow2.f32 %v309_v62  ;;  %v241_v53 = vsel %vm237_vm0, 1.0, %v498_v52  ;;  %v243_v58 = vsel %vm239_vm1, 1.0, %v498_v52  ;;  %v229_v62 = vmul.f32 0.5, %v592_v29 }
  0xf8   :  { %492 = vpow2.f32 %v313_v0  ;;  %v405_v0 = vld [vmem:[%s645_s3] ss:$0 sm:$0xff] }
  0xf9   :  { %494 = vpow2.f32 %v311_v10 }
  0xfa   :  { %496 = vpow2.f32 %v315_v13 }
  0xfe   :  { %v483_v59 = vpop.eup %482 }
  0xff   :  { %v485_v60 = vpop.eup %484  ;;  %v265_v61 = vmul.f32 1.0614054, %v483_v59 }
 0x100   :  { %v267_v63 = vmul.f32 1.0614054, %v485_v60 }
 0x101   :  { %v269_v2 = vadd.f32 -1.4531521, %v265_v61 }
 0x102   :  { %v271_v4 = vadd.f32 -1.4531521, %v267_v63  ;;  %v487_v5 = vpop.eup %486 }
 0x103   :  { %v273_v6 = vmul.f32 %v483_v59, %v269_v2  ;;  %v489_v7 = vpop.eup %488  ;;  %v266_v9 = vmul.f32 1.0614054, %v487_v5 }
 0x104   :  { %v275_v8 = vmul.f32 %v485_v60, %v271_v4  ;;  %v268_v12 = vmul.f32 1.0614054, %v489_v7  ;;  %v491_v38 = vpop.eup %490 }
 0x105   :  { %v277_v11 = vadd.f32 1.4214138, %v273_v6  ;;  %v270_v15 = vadd.f32 -1.4531521, %v266_v9  ;;  %v493_v45 = vpop.eup %492 }
 0x106   :  { %v279_v14 = vadd.f32 1.4214138, %v275_v8  ;;  %v272_v17 = vadd.f32 -1.4531521, %v268_v12  ;;  %v495_v56 = vpop.eup %494  ;;  %v244_v8 = vsel %vm240_vm3, 1.0, %v498_v52 }
 0x107   :  { %v281_v16 = vmul.f32 %v483_v59, %v277_v11  ;;  %v274_v19 = vmul.f32 %v487_v5, %v270_v15  ;;  %v230_v11 = vmul.f32 0.5, %v604_v39 }
 0x108   :  { %v283_v18 = vmul.f32 %v485_v60, %v279_v14  ;;  %v276_v21 = vmul.f32 %v489_v7, %v272_v17 }
 0x109   :  { %v285_v20 = vadd.f32 -0.28449672, %v281_v16  ;;  %v278_v23 = vadd.f32 1.4214138, %v274_v19 }
 0x10a   :  { %v287_v22 = vadd.f32 -0.28449672, %v283_v18  ;;  %v280_v25 = vadd.f32 1.4214138, %v276_v21 }
 0x10b   :  { %v289_v24 = vmul.f32 %v483_v59, %v285_v20  ;;  %v282_v27 = vmul.f32 %v487_v5, %v278_v23 }
 0x10c   :  { %v291_v26 = vmul.f32 %v485_v60, %v287_v22  ;;  %v284_v31 = vmul.f32 %v489_v7, %v280_v25 }
 0x10d   :  { %v293_v28 = vadd.f32 0.2548296, %v289_v24  ;;  %v286_v35 = vadd.f32 -0.28449672, %v282_v27 }
 0x10e   :  { %v295_v32 = vadd.f32 0.2548296, %v291_v26  ;;  %v288_v37 = vadd.f32 -0.28449672, %v284_v31 }
 0x10f   :  { %v297_v36 = vmul.f32 %v483_v59, %v293_v28  ;;  %v290_v42 = vmul.f32 %v487_v5, %v286_v35 }
 0x110   :  { %v299_v41 = vmul.f32 %v485_v60, %v295_v32  ;;  %v292_v47 = vmul.f32 %v489_v7, %v288_v37  ;;  %v497_v60 = vpop.eup %496 }
 0x111   :  { %v317_v46 = vmul.f32 %v491_v38, %v297_v36  ;;  %v294_v49 = vadd.f32 0.2548296, %v290_v42 }
 0x112   :  { %v319_v48 = vmul.f32 %v493_v45, %v299_v41  ;;  %v296_v51 = vadd.f32 0.2548296, %v292_v47 }
 0x113   :  { %v321_v50 = vsub.f32 1.0, %v317_v46  ;;  %v298_v55 = vmul.f32 %v487_v5, %v294_v49  ;;  %v242_v5 = vsel %vm238_vm2, 1.0, %v498_v52 }
 0x114   :  { %v323_v54 = vsub.f32 1.0, %v319_v48  ;;  %v300_v59 = vmul.f32 %v489_v7, %v296_v51 }
 0x115   :  { %v325_v57 = vmul.f32 %v321_v50, %v241_v53  ;;  %v318_v33 = vmul.f32 %v495_v56, %v298_v55 }
 0x116   :  { %v327_v61 = vmul.f32 %v323_v54, %v243_v58  ;;  %v320_v63 = vmul.f32 %v497_v60, %v300_v59 }
 0x117   :  { %v329_v34 = vadd.f32 1.0, %v325_v57  ;;  %v322_v3 = vsub.f32 1.0, %v318_v33 }
 0x118   :  { %v331_v2 = vadd.f32 1.0, %v327_v61  ;;  %v324_v6 = vsub.f32 1.0, %v320_v63 }
 0x119   :  { %v333_v4 = vmul.f32 %v329_v34, %v229_v62  ;;  %v326_v7 = vmul.f32 %v322_v3, %v242_v5 }
 0x11a   :  { %v335_v29 = vmul.f32 %v331_v2, %v231_v1  ;;  %v328_v9 = vmul.f32 %v324_v6, %v244_v8 }
 0x11b   :  { %v344_v44 = vmul.f32 %v405_v0, %v333_v4  ;;  %v330_v12 = vadd.f32 1.0, %v326_v7 }
 0x11c   :  { %v346_v10 = vmul.f32 %v405_v0, %v335_v29  ;;  %v332_v14 = vadd.f32 1.0, %v328_v9 }
 0x11d   :  { %v355_v13 = vadd.f32 %v406_v43, %v344_v44  ;;  %v334_v16 = vmul.f32 %v330_v12, %v230_v11 }
 0x11e   :  { %v357_v15 = vadd.f32 %v406_v43, %v346_v10  ;;  %v336_v18 = vmul.f32 %v332_v14, %v232_v30 }
 0x11f   :  { %v411_v17 = vpack.c.bf16 %v355_v13, %v355_v13  ;;  %v345_v20 = vmul.f32 %v405_v0, %v334_v16 }
 0x120   :  { %v413_v19 = vpack.c.bf16 %v357_v15, %v357_v15  ;;  %v347_v21 = vmul.f32 %v405_v0, %v336_v18 }
 0x121   :  { %376 = vst.msk [vmem:[%s647_s5] sm:$0xf] %vm375_vm4, %v411_v17  ;;  %v356_v39 = vadd.f32 %v406_v43, %v345_v20 }
 0x122   :  { %378 = vst.msk [vmem:[%s647_s5 + $0x8] sm:$0xf] %vm375_vm4, %v413_v19  ;;  %v358_v22 = vadd.f32 %v406_v43, %v347_v21 }
 0x123   :  { %v412_v40 = vpack.c.bf16 %v356_v39, %v356_v39 }
 0x124   :  { %v414_v23 = vpack.c.bf16 %v358_v22, %v358_v22 }
 0x125   :  { %377 = vst.msk [vmem:[%s647_s5 + $0x4] sm:$0xf] %vm375_vm4, %v412_v40 }
 0x126   :  { %379 = vst.msk [vmem:[%s647_s5 + $0xc] sm:$0xf] %vm375_vm4, %v414_v23 }

// kernel: convmixer_forward.7
= control target key start
LH: loop header
LB: loop body
LE: loop exit
PB: predicated region body
PF: predicated region fallthrough
CT: control target
= control target key end

     0   :  { %v187_v1 = vmov 0.0   ;;  %vm188_vm0 = vmmov 0   ;;  %vm24_vm1 = vcmask 261120   ;;  %s233_s0 = inlined_call_operand.vmem [shape: bf16[2,16,32], index: 0, kind: input, shape index: {}]   ;;  %s234_s1 = inlined_call_operand.vmem [shape: bf16[32,128], index: 1, kind: input, shape index: {}]   ;;  %s235_s2 = inlined_call_operand.vmem [shape: f32[1,128], index: 2, kind: input, shape index: {}]   ;;  %s236_s3 = inlined_call_operand.hbm [shape: f32[2,128], index: 3, kind: output, shape index: {}]  }
   0x1   :  { %v163_v0 = vld [vmem:[%s234_s1 + $0x8] sm:$0xff]   ;;  %152 = vmatprep.subr.bf16.mxu0 %v187_v1  ;;  %v164_v2 = vld [vmem:[%s234_s1] sm:$0xff]   ;;  %156 = vmatprep.mubr.msk.bf16.mxu0 %vm188_vm0, %v187_v1 }
   0x2   :  { %153 = vmatpush3.bf16.msra.mxu0 %v163_v0  ;;  %v141_v3 = vld [vmem:[%s233_s0] sm:$0xff]   ;;  %v148_v4 = vld [vmem:[%s233_s0 + $0x8] sm:$0xff]  }
   0x3   :  { %154 = vmatprep.subr.bf16.mxu0 %v187_v1  ;;  %v142_v5 = vunpack.c.l.bf16 %v141_v3  ;;  %v143_v6 = vunpack.c.h.bf16 %v141_v3  ;;  %v146_v7 = vunpack.c.l.bf16 %v148_v4  ;;  %v147_v8 = vunpack.c.h.bf16 %v148_v4 }
   0x4   :  { %8 = vsyncpa [#allocation3], 0  ;;  %vm63_vm2 = vcmask 1041409   ;;  %v136_v35 = vld [vmem:[%s235_s2] ss:$0 sm:$0xff]  ;;  %s189_s20 = smov [#allocation2]  }
   0x5   :  { %v25_v9 = vsel %vm24_vm1, %v142_v5, 0.0  ;;  %v26_v10 = vsel %vm24_vm1, %v143_v6, 0.0  ;;  %v34_v11 = vsel %vm24_vm1, %v146_v7, 0.0  ;;  %v35_v12 = vsel %vm24_vm1, %v147_v8, 0.0  ;;  %s128_s21 = sshll.u32 %s189_s20, 4  ;;  %s129_s21 = int_to_ptr.vmem [resolvable:$true] %s128_s21 }
   0x6   :  { %155 = vmatpush3.bf16.msra.mxu0 %v164_v2  ;;  %v27_v13 = vadd.f32 %v26_v10, %v25_v9  ;;  %v36_v14 = vadd.f32 %v35_v12, %v34_v11  ;;  %s165_s22 = scalar_lea.vmem %s129_s21, 32  ;;  %p170_p1 = scmp.lt.s32.totalorder %s129_s21, %s129_s21 }
   0x7   :  { %p166_p0 = scmp.ne.s32.totalorder %s129_s21, %s165_s22  ;;  %p171_p2 = scmp.lt.s32.totalorder %s165_s22, %s165_s22 }
   0x8   :  { %v28_v15 = vrot.slane %v27_v13, 4  ;;  %v37_v16 = vrot.slane %v36_v14, 4 }
   0x9   :  { %p172_p3 = por %p171_p2, %p170_p1 }
   0xa   :  { %v29_v17 = vadd.f32 %v28_v15, %v27_v13  ;;  %v38_v18 = vadd.f32 %v37_v16, %v36_v14 }
   0xb   :  { %p173_p4 = pnand %p172_p3, %p166_p0 }
   0xc   :  { %v30_v19 = vrot.slane %v29_v17, 2  ;;  %v39_v20 = vrot.slane %v38_v18, 2 }
   0xe   :  { %v31_v21 = vadd.f32 %v30_v19, %v29_v17  ;;  %v40_v22 = vadd.f32 %v39_v20, %v38_v18 }
  0x10   :  { %v32_v23 = vrot.slane %v31_v21, 1  ;;  %v41_v24 = vrot.slane %v40_v22, 1 }
  0x12   :  { %v33_v25 = vadd.f32 %v32_v23, %v31_v21  ;;  %v42_v26 = vadd.f32 %v41_v24, %v40_v22 }
  0x14   :  { %v44_v27 = vmul.f32 0.0625, %v33_v25  ;;  %v45_v28 = vmul.f32 0.0625, %v42_v26 }
  0x16   :  { %v46_v29 = vpack.c.bf16 %v44_v27, %v44_v27  ;;  %v47_v30 = vpack.c.bf16 %v45_v28, %v45_v28 }
  0x18   :  { %v61_v31 = vunpack.c.l.b16 %v46_v29  ;;  %v62_v32 = vunpack.c.l.b16 %v47_v30 }
  0x1a   :  { %v64_v33 = vsel %vm63_vm2, %v62_v32, %v61_v31 }
  0x1b   :  { %v65_v34 = vpack.c.b16 %v64_v33, %v64_v33 }
  0x1d   :  { %157 = vmatmul.mubr.msk.bf16.vlgmr.msra.gmra.mxu0 %vm24_vm1, %v65_v34 }
  0xdd   :  { %v115_v36 = vpop.f32.mrf.mxu0 }
  0xde   :  { %v116_v37 = vadd.f32 %v136_v35, %v115_v36 }
  0xdf   :  { %v158_v38 = vpop.f32.mrf.mxu0 }
  0xe0   :  { %121 = vst [vmem:[#allocation2] sm:$0x3] %v116_v37 }
  0xe1   :  { %v118_v39 = vpop.f32.mrf.mxu0 }
  0xe2   :  { %176 = shalt.err (!%p173_p4)
}
  0xe3   :  { %131 = dma.vmem_to_hbm [thread:$0]  %s129_s21, 32, %s236_s3, [#allocation3]   ;;  %v159_v40 = vpop.f32.mrf.mxu0 }
  0xe4   :  { %185 = dma.done.wait [#allocation3], 32  }
  0xe5   :  { %186 = vsyncadd [#allocation3], 4294967264 }
  0xe6   :  { %135 = vsyncpa [#allocation3], 1 }

// kernel: convmixer_forward.5
= control target key start
LH: loop header
LB: loop body
LE: loop exit
PB: predicated region body
PF: predicated region fallthrough
CT: control target
= control target key end

     0   :  { %s1476_s30 = smov 0   ;;  %s1478_s10 = smov 0   ;;  %s1759_s0 = inlined_call_operand.vmem [shape: bf16[2,4,4,32], index: 0, kind: input, shape index: {}]   ;;  %s1760_s1 = inlined_call_operand.vmem [shape: f32[3,3,32], index: 1, kind: input, shape index: {}]   ;;  %s1761_s2 = inlined_call_operand.vmem [shape: f32[1,32], index: 2, kind: input, shape index: {}]   ;;  %s1762_s3 = inlined_call_operand.vmem [shape: f32[1,32], index: 3, kind: input, shape index: {}]   ;;  %s1763_s4 = inlined_call_operand.vmem [shape: f32[1,32], index: 4, kind: input, shape index: {}]   ;;  %s1764_s5 = inlined_call_operand.vmem [shape: bf16[32,32], index: 5, kind: input, shape index: {}]   ;;  %s1765_s6 = inlined_call_operand.vmem [shape: f32[1,32], index: 6, kind: input, shape index: {}]   ;;  %s1766_s7 = inlined_call_operand.vmem [shape: f32[1,32], index: 7, kind: input, shape index: {}]   ;;  %s1767_s8 = inlined_call_operand.vmem [shape: f32[1,32], index: 8, kind: input, shape index: {}]   ;;  %s1768_s9 = inlined_call_operand.vmem [shape: bf16[2,4,4,32], index: 9, kind: output, shape index: {}]  }
   0x1   :  { %s1480_s11 = smov 0  }
   0x2 LB: > { %s31_s12 = sadd.s32 1, %s1417_s10  ;;  %p1251_p0 = scmp.ge.s32.totalorder %s1421_s11, 1  ;;  %s1421_s11 = sphi %s1480_s11, %s19_s11   ;;  %s1417_s10 = sphi %s1478_s10, %s1770_s10   ;;  %s1413_s30 = sphi %s1476_s30, %s1769_s30  }
   0x3   : > { %p33_p1 = scmp.ge.s32.totalorder %s31_s12, 2  ;;  %p301_p2 = scmp.lt.s32.totalorder %s1421_s11, 3 }
   0x5   : > { %s1772_s12 = smov (%p33_p1, %s31_s12), 0  ;;  %p302_p3 = pnand %p1251_p0, %p301_p2 }
   0x6   : > { %p341_p4 = scmp.lt.s32.totalorder (!%p302_p3), %s1413_s30, 1 }
   0x7   : > { %305 = sbr.rel (%p302_p3) target bundleno = 371 (0x173), region = 56 }
   0xc   : > { %v1499_v0 = vld [vmem:[%s1764_s5 + $0x8] sm:$0xff]   ;;  %v396_v1 = vlaneseq  ;;  %v1423_v2 = vmov 0.0   ;;  %v1507_v3 = vld [vmem:[%s1764_s5] sm:$0xff]   ;;  %vm361_vm0 = vcmask 259072   ;;  %vm366_vm1 = vcmask 253952   ;;  %s1774_s30 = smov (!%p341_p4, %s1413_s30), 1 }
   0xd   : > { %1306 = vmatprep.subr.bf16.mxu0 %v1423_v2  ;;  %1314 = vmatprep.subr.bf16.mxu1 %v1423_v2  ;;  %vm1424_vm2 = vmmov 0   ;;  %362 = vst.msk [vmem:[#allocation2] sm:$0x3f] %vm361_vm0, %v1423_v2  ;;  %364 = vst.msk [vmem:[#allocation2 + $0x28] sm:$0x3f] %vm361_vm0, %v1423_v2  ;;  %s1292_s19 = sshll.u32 %s1774_s30, 3 }
   0xe   : > { %1307 = vmatpush3.bf16.msra.mxu0 %v1499_v0  ;;  %1315 = vmatpush3.bf16.msra.mxu1 %v1499_v0  ;;  %367 = vst.msk [vmem:[#allocation2 + $0x8] sm:$0x1] %vm366_vm1, %v1423_v2  ;;  %368 = vst.msk [vmem:[#allocation2 + $0x10] sm:$0x1] %vm366_vm1, %v1423_v2  ;;  %v397_v4 = vshrl.u32 %v396_v1, 7  ;;  %s1543_s22 = scalar_lea.vmem %s1759_s0, %s1292_s19  ;;  %vm383_vm3 = vcmask 257024   ;;  %s1733_s25 = scalar_lea.vmem %s1768_s9, %s1292_s19 }
   0xf   : > { %1308 = vmatprep.subr.bf16.mxu0 %v1423_v2  ;;  %1310 = vmatprep.mubr.msk.bf16.mxu0 %vm1424_vm2, %v1423_v2  ;;  %371 = vst.msk [vmem:[#allocation2 + $0xd] sm:$0x1] %vm366_vm1, %v1423_v2  ;;  %372 = vst.msk [vmem:[#allocation2 + $0x15] sm:$0x1] %vm366_vm1, %v1423_v2  ;;  %v395_v5 = vld [vmem:[%s1760_s1] sm:$0x7] }
  0x10   : > { %369 = vst.msk [vmem:[#allocation2 + $0x18] sm:$0x1] %vm366_vm1, %v1423_v2  ;;  %370 = vst.msk [vmem:[#allocation2 + $0x20] sm:$0x1] %vm366_vm1, %v1423_v2  ;;  %1316 = vmatprep.subr.bf16.mxu1 %v1423_v2  ;;  %1318 = vmatprep.mubr.msk.bf16.mxu1 %vm1424_vm2, %v1423_v2  ;;  %v398_v6 = vsub.s32 0, %v397_v4  ;;  %v410_v7 = vsub.s32 1, %v397_v4 }
  0x11   : > { %373 = vst.msk [vmem:[#allocation2 + $0x1d] sm:$0x1] %vm366_vm1, %v1423_v2  ;;  %374 = vst.msk [vmem:[#allocation2 + $0x25] sm:$0x1] %vm366_vm1, %v1423_v2  ;;  %v434_v8 = vsub.s32 2, %v397_v4  ;;  %vm773_vm7 = vcmask 261120  }
  0x12   : > { %1309 = vmatpush3.bf16.msra.mxu0 %v1507_v3  ;;  %1317 = vmatpush3.bf16.msra.mxu1 %v1507_v3  ;;  %v1545_v9 = vrot.slane %v395_v5, %v398_v6  ;;  %v1547_v10 = vrot.slane %v395_v5, %v410_v7  ;;  %v375_v12 = vld [vmem:[%s1543_s22] sm:$0x3]  ;;  %v376_v13 = vld [vmem:[%s1543_s22 + $0x2] sm:$0x3]  ;;  %v377_v14 = vld [vmem:[%s1543_s22 + $0x4] sm:$0x3] }
  0x13   : > { %v1549_v11 = vrot.slane %v395_v5, %v434_v8  ;;  %1322 = vmatprep.subr.bf16.mxu0 %v1423_v2  ;;  %1330 = vmatprep.subr.bf16.mxu1 %v1423_v2  ;;  %v378_v15 = vld [vmem:[%s1543_s22 + $0x6] sm:$0x3]  ;;  %v379_v16 = vunpack.c.l.bf16 %v375_v12  ;;  %v380_v17 = vunpack.c.l.bf16 %v376_v13  ;;  %v381_v18 = vunpack.c.l.bf16 %v377_v14  ;;  %v1265_v27 = vld [vmem:[%s1760_s1 + $0x8] sm:$0x7] }
  0x14   : > { %v382_v19 = vunpack.c.l.bf16 %v378_v15  ;;  %v391_v20 = vld [vmem:[#allocation2] sm:$0x3f]  ;;  %v1576_v32 = vrot.slane %v1265_v27, %v410_v7  ;;  %v1578_v36 = vrot.slane %v1265_v27, %v398_v6  ;;  %v1583_v41 = vrot.slane %v1265_v27, %v434_v8 }
  0x15   : > { %384 = vst.msk [vmem:[#allocation2 + $0x9] sm:$0xf] %vm383_vm3, %v379_v16  ;;  %385 = vst.msk [vmem:[#allocation2 + $0x11] sm:$0xf] %vm383_vm3, %v380_v17  ;;  %v400_v21 = vmul.f32 %v1545_v9, %v391_v20  ;;  %v412_v22 = vmul.f32 %v1547_v10, %v391_v20  ;;  %v436_v23 = vmul.f32 %v1549_v11, %v391_v20  ;;  %v1260_v24 = vld [vmem:[%s1760_s1 + $0x4] sm:$0x7] }
  0x16   : > { %386 = vst.msk [vmem:[#allocation2 + $0x19] sm:$0xf] %vm383_vm3, %v381_v18  ;;  %387 = vst.msk [vmem:[#allocation2 + $0x21] sm:$0xf] %vm383_vm3, %v382_v19  ;;  %v1570_v29 = vrot.slane %v1260_v24, %v398_v6  ;;  %v1572_v30 = vrot.slane %v1260_v24, %v410_v7  ;;  %v1574_v31 = vrot.slane %v1260_v24, %v434_v8  ;;  %v1604_v24 = vld [vmem:[%s1761_s2] ss:$0 sm:$0xff] }
  0x17   : > { %v420_v25 = vrot.slane %v412_v22, 1  ;;  %v444_v26 = vrot.slane %v436_v23, 2  ;;  %vm861_vm11 = vcmask 254976  }
  0x19   : > { %v428_v28 = vadd.f32 %v420_v25, %v400_v21 }
  0x1b   : > { %v452_v33 = vadd.f32 %v444_v26, %v428_v28 }
  0x1c   : > { %v1256_v34 = vld [vmem:[#allocation2 + $0x8] sm:$0x3f]  ;;  %v1261_v35 = vld [vmem:[#allocation2 + $0x10] sm:$0x3f] }
  0x1d   : > { %v392_v37 = vld [vmem:[#allocation2 + $0x8] sm:$0x3f]  ;;  %v469_v38 = vmul.f32 %v1256_v34, %v1570_v29  ;;  %v481_v39 = vmul.f32 %v1256_v34, %v1572_v30  ;;  %v505_v40 = vmul.f32 %v1256_v34, %v1574_v31  ;;  %v550_v42 = vmul.f32 %v1261_v35, %v1576_v32  ;;  %v1257_v45 = vld [vmem:[#allocation2 + $0x10] sm:$0x3f]  ;;  %v1262_v52 = vld [vmem:[#allocation2 + $0x18] sm:$0x3f] }
  0x1e   : > { %v401_v43 = vmul.f32 %v1545_v9, %v392_v37  ;;  %v413_v44 = vmul.f32 %v1547_v10, %v392_v37  ;;  %v437_v49 = vmul.f32 %v1549_v11, %v392_v37  ;;  %v538_v50 = vmul.f32 %v1261_v35, %v1578_v36  ;;  %v393_v57 = vld [vmem:[#allocation2 + $0x10] sm:$0x3f]  ;;  %v1258_v1 = vld [vmem:[#allocation2 + $0x18] sm:$0x3f]  ;;  %v1259_v34 = vld [vmem:[#allocation2 + $0x20] sm:$0x3f] }
  0x1f   : > { %v473_v46 = vadd.f32 %v469_v38, %v452_v33  ;;  %v489_v47 = vrot.slane %v481_v39, 1  ;;  %v513_v48 = vrot.slane %v505_v40, 2  ;;  %v574_v54 = vmul.f32 %v1261_v35, %v1583_v41  ;;  %v394_v19 = vld [vmem:[#allocation2 + $0x18] sm:$0x3f]  ;;  %v1263_v33 = vld [vmem:[#allocation2 + $0x20] sm:$0x3f] }
  0x20   : > { %v421_v51 = vrot.slane %v413_v44, 1  ;;  %v445_v55 = vrot.slane %v437_v49, 2  ;;  %v482_v56 = vmul.f32 %v1257_v45, %v1572_v30  ;;  %v470_v59 = vmul.f32 %v1257_v45, %v1570_v29 }
  0x21   : > { %v497_v53 = vadd.f32 %v489_v47, %v473_v46  ;;  %v506_v60 = vmul.f32 %v1257_v45, %v1574_v31  ;;  %v558_v62 = vrot.slane %v550_v42, 1  ;;  %v551_v63 = vmul.f32 %v1262_v52, %v1576_v32 }
  0x22   : > { %v429_v58 = vadd.f32 %v421_v51, %v401_v43  ;;  %v490_v5 = vrot.slane %v482_v56, 1  ;;  %v402_v6 = vmul.f32 %v1545_v9, %v393_v57  ;;  %v414_v7 = vmul.f32 %v1547_v10, %v393_v57 }
  0x23   : > { %v521_v61 = vadd.f32 %v513_v48, %v497_v53  ;;  %v582_v12 = vrot.slane %v574_v54, 2  ;;  %v575_v13 = vmul.f32 %v1262_v52, %v1583_v41  ;;  %v438_v14 = vmul.f32 %v1549_v11, %v393_v57 }
  0x24   : > { %v453_v4 = vadd.f32 %v445_v55, %v429_v58  ;;  %v514_v16 = vrot.slane %v506_v60, 2  ;;  %v422_v17 = vrot.slane %v414_v7, 1  ;;  %v483_v18 = vmul.f32 %v1258_v1, %v1572_v30  ;;  %v1264_v58 = vld [vmem:[#allocation2 + $0x28] sm:$0x3f] }
  0x25   : > { %v542_v8 = vadd.f32 %v538_v50, %v521_v61  ;;  %v539_v21 = vmul.f32 %v1262_v52, %v1578_v36  ;;  %v559_v22 = vrot.slane %v551_v63, 1  ;;  %v446_v23 = vrot.slane %v438_v14, 2 }
  0x26   : > { %v474_v15 = vadd.f32 %v470_v59, %v453_v4  ;;  %v430_v26 = vadd.f32 %v422_v17, %v402_v6  ;;  %v471_v27 = vmul.f32 %v1258_v1, %v1570_v29  ;;  %v507_v28 = vmul.f32 %v1258_v1, %v1574_v31 }
  0x27   : > { %v566_v20 = vadd.f32 %v558_v62, %v542_v8  ;;  %v583_v37 = vrot.slane %v575_v13, 2  ;;  %v403_v38 = vmul.f32 %v1545_v9, %v394_v19  ;;  %v415_v39 = vmul.f32 %v1547_v10, %v394_v19 }
  0x28   : > { %v498_v25 = vadd.f32 %v490_v5, %v474_v15  ;;  %v454_v42 = vadd.f32 %v446_v23, %v430_v26  ;;  %v491_v43 = vrot.slane %v483_v18, 1  ;;  %v439_v44 = vmul.f32 %v1549_v11, %v394_v19 }
  0x29   : > { %v590_v35 = vadd.f32 %v582_v12, %v566_v20  ;;  %v552_v46 = vmul.f32 %v1263_v33, %v1576_v32  ;;  %v423_v47 = vrot.slane %v415_v39, 1  ;;  %v484_v48 = vmul.f32 %v1259_v34, %v1572_v30 }
  0x2a   : > { %v522_v40 = vadd.f32 %v514_v16, %v498_v25  ;;  %v475_v50 = vadd.f32 %v471_v27, %v454_v42  ;;  %v515_v51 = vrot.slane %v507_v28, 2  ;;  %v447_v52 = vrot.slane %v439_v44, 2 }
  0x2b   : > { %v1612_v45 = vadd.f32 %v1604_v24, %v590_v35  ;;  %v431_v10 = vadd.f32 %v423_v47, %v403_v38  ;;  %v472_v53 = vmul.f32 %v1259_v34, %v1570_v29  ;;  %v508_v11 = vmul.f32 %v1259_v34, %v1574_v31 }
  0x2c   : > { %v543_v49 = vadd.f32 %v539_v21, %v522_v40  ;;  %v499_v55 = vadd.f32 %v491_v43, %v475_v50  ;;  %v540_v56 = vmul.f32 %v1263_v33, %v1578_v36  ;;  %v576_v57 = vmul.f32 %v1263_v33, %v1583_v41 }
  0x2d   : > { %v1617_v9 = vmul.f32 0.70710677, %v1612_v45  ;;  %v455_v59 = vadd.f32 %v447_v52, %v431_v10  ;;  %v492_v60 = vrot.slane %v484_v48, 1  ;;  %v560_v63 = vrot.slane %v552_v46, 1 }
  0x2e   : > { %v567_v54 = vadd.f32 %v559_v22, %v543_v49  ;;  %v523_v62 = vadd.f32 %v515_v51, %v499_v55  ;;  %v516_v5 = vrot.slane %v508_v11, 2  ;;  %v553_v29 = vmul.f32 %v1264_v58, %v1576_v32 }
  0x2f   : > { %v621_v30 = vand.u32 2147483647, %v1617_v9  ;;  %v476_v4 = vadd.f32 %v472_v53, %v455_v59  ;;  %v584_v7 = vrot.slane %v576_v57, 2  ;;  %v541_v13 = vmul.f32 %v1264_v58, %v1578_v36 }
  0x30   : > { %v591_v61 = vadd.f32 %v583_v37, %v567_v54  ;;  %v544_v6 = vadd.f32 %v540_v56, %v523_v62  ;;  %v577_v14 = vmul.f32 %v1264_v58, %v1583_v41  ;;  %v561_v18 = vrot.slane %v553_v29, 1 }
  0x31   : > { %v625_v1 = vmul.f32 0.3275911, %v621_v30  ;;  %v500_v12 = vadd.f32 %v492_v60, %v476_v4  ;;  %v677_v25 = vsub.f32 0.0, %v621_v30  ;;  %vm613_vm4 = vcmp.ge.f32.partialorder %v1617_v9, 0.0 }
  0x32   : > { %v1626_v31 = vadd.f32 %v1604_v24, %v591_v61  ;;  %v568_v16 = vadd.f32 %v560_v63, %v544_v6  ;;  %v585_v21 = vrot.slane %v577_v14, 2  ;;  %v605_v9 = vmul.f32 0.5, %v1612_v45 }
  0x33   : > { %v629_v8 = vadd.f32 1.0, %v625_v1  ;;  %v524_v17 = vadd.f32 %v516_v5, %v500_v12  ;;  %v681_v33 = vmul.f32 %v677_v25, %v621_v30 }
  0x34   : > { %v1631_v15 = vmul.f32 0.70710677, %v1626_v31  ;;  %v592_v19 = vadd.f32 %v584_v7, %v568_v16 }
  0x35   : > { %1367 = vrcp.f32 %v629_v8  ;;  %v545_v20 = vadd.f32 %v541_v13, %v524_v17  ;;  %v685_v40 = vmul.f32 1.442695, %v681_v33  ;;  %v1425_v17 = vmov -1.0  }
  0x36   : > { %v622_v32 = vand.u32 2147483647, %v1631_v15  ;;  %v1635_v23 = vadd.f32 %v1604_v24, %v592_v19  ;;  %vm614_vm5 = vcmp.ge.f32.partialorder %v1631_v15, 0.0  ;;  %v1268_v15 = vld [vmem:[%s1763_s4] ss:$0 sm:$0xff] }
  0x37   : > { %v569_v36 = vadd.f32 %v561_v18, %v545_v20  ;;  %v617_v18 = vsel %vm613_vm4, 1.0, %v1425_v17 }
  0x38   : > { %v626_v22 = vmul.f32 0.3275911, %v622_v32  ;;  %v1638_v41 = vmul.f32 0.70710677, %v1635_v23  ;;  %v678_v38 = vsub.f32 0.0, %v622_v32 }
  0x39   : > { %v593_v27 = vadd.f32 %v585_v21, %v569_v36 }
  0x3a   : > { %v630_v26 = vadd.f32 1.0, %v626_v22  ;;  %v623_v28 = vand.u32 2147483647, %v1638_v41  ;;  %v682_v47 = vmul.f32 %v678_v38, %v622_v32  ;;  %vm615_vm6 = vcmp.ge.f32.partialorder %v1638_v41, 0.0 }
  0x3b   : > { %v1642_v34 = vadd.f32 %v1604_v24, %v593_v27 }
  0x3c   : > { %1369 = vrcp.f32 %v630_v26  ;;  %v627_v35 = vmul.f32 0.3275911, %v623_v28  ;;  %v679_v50 = vsub.f32 0.0, %v623_v28  ;;  %v687_v51 = vmul.f32 1.442695, %v682_v47 }
  0x3d   : > { %v1645_v37 = vmul.f32 0.70710677, %v1642_v34 }
  0x3e   : > { %v631_v39 = vadd.f32 1.0, %v627_v35  ;;  %v683_v11 = vmul.f32 %v679_v50, %v623_v28 }
  0x3f   : > { %v624_v42 = vand.u32 2147483647, %v1645_v37  ;;  %vm616_vm8 = vcmp.ge.f32.partialorder %v1645_v37, 0.0 }
  0x40   : > { %1371 = vrcp.f32 %v631_v39  ;;  %v689_v30 = vmul.f32 1.442695, %v683_v11  ;;  %v1655_v39 = vld [vmem:[%s1762_s3] ss:$0 sm:$0xff]  ;;  %v620_v37 = vsel %vm616_vm8, 1.0, %v1425_v17 }
  0x41   : > { %v628_v46 = vmul.f32 0.3275911, %v624_v42  ;;  %1373 = vpow2.f32 %v685_v40  ;;  %v680_v55 = vsub.f32 0.0, %v624_v42  ;;  %v737_v40 = vld [vmem:[%s1543_s22] sm:$0x3] }
  0x42   : > { %v1368_v43 = vpop.eup %1367 }
  0x43   : > { %v641_v44 = vmul.f32 1.0614054, %v1368_v43  ;;  %v632_v49 = vadd.f32 1.0, %v628_v46  ;;  %v684_v61 = vmul.f32 %v680_v55, %v624_v42  ;;  %v618_v46 = vsel %vm614_vm5, 1.0, %v1425_v17 }
  0x45   : > { %v645_v48 = vadd.f32 -1.4531521, %v641_v44  ;;  %1375 = vrcp.f32 %v632_v49  ;;  %v691_v7 = vmul.f32 1.442695, %v684_v61 }
  0x46   : > { %1377 = vpow2.f32 %v687_v51 }
  0x47   : > { %v649_v24 = vmul.f32 %v1368_v43, %v645_v48  ;;  %1379 = vpow2.f32 %v689_v30  ;;  %v619_v30 = vsel %vm615_vm6, 1.0, %v1425_v17 }
  0x48   : > { %1381 = vpow2.f32 %v691_v7 }
  0x49   : > { %v1370_v52 = vpop.eup %1369  ;;  %v653_v10 = vadd.f32 1.4214138, %v649_v24  ;;  %v741_v24 = vunpack.c.l.bf16 %v737_v40 }
  0x4a   : > { %v642_v53 = vmul.f32 1.0614054, %v1370_v52 }
  0x4b   : > { %v657_v54 = vmul.f32 %v1368_v43, %v653_v10 }
  0x4c   : > { %v646_v56 = vadd.f32 -1.4531521, %v642_v53 }
  0x4d   : > { %v661_v57 = vadd.f32 -0.28449672, %v657_v54  ;;  %v1372_v59 = vpop.eup %1371 }
  0x4e   : > { %v650_v58 = vmul.f32 %v1370_v52, %v646_v56  ;;  %v643_v63 = vmul.f32 1.0614054, %v1372_v59  ;;  %v1374_v4 = vpop.eup %1373 }
  0x4f   : > { %v665_v60 = vmul.f32 %v1368_v43, %v661_v57 }
  0x50   : > { %v654_v62 = vadd.f32 1.4214138, %v650_v58  ;;  %v647_v29 = vadd.f32 -1.4531521, %v643_v63  ;;  %v738_v58 = vld [vmem:[%s1543_s22 + $0x2] sm:$0x3] }
  0x51   : > { %v669_v1 = vadd.f32 0.2548296, %v665_v60 }
  0x52   : > { %v658_v5 = vmul.f32 %v1370_v52, %v654_v62  ;;  %v1376_v8 = vpop.eup %1375  ;;  %v651_v13 = vmul.f32 %v1372_v59, %v647_v29 }
  0x53   : > { %v673_v6 = vmul.f32 %v1368_v43, %v669_v1  ;;  %v644_v16 = vmul.f32 1.0614054, %v1376_v8  ;;  %v1378_v36 = vpop.eup %1377 }
  0x54   : > { %v662_v12 = vadd.f32 -0.28449672, %v658_v5  ;;  %v655_v19 = vadd.f32 1.4214138, %v651_v13  ;;  %v1380_v49 = vpop.eup %1379 }
  0x55   : > { %v693_v14 = vmul.f32 %v1374_v4, %v673_v6  ;;  %v648_v21 = vadd.f32 -1.4531521, %v644_v16  ;;  %v1382_v61 = vpop.eup %1381  ;;  %v607_v4 = vmul.f32 0.5, %v1635_v23 }
  0x56   : > { %v666_v32 = vmul.f32 %v1370_v52, %v662_v12  ;;  %v659_v25 = vmul.f32 %v1372_v59, %v655_v19 }
  0x57   : > { %v697_v20 = vsub.f32 1.0, %v693_v14  ;;  %v652_v27 = vmul.f32 %v1376_v8, %v648_v21  ;;  %v608_v14 = vmul.f32 0.5, %v1642_v34 }
  0x58   : > { %v670_v22 = vadd.f32 0.2548296, %v666_v32  ;;  %v663_v33 = vadd.f32 -0.28449672, %v659_v25 }
  0x59   : > { %v701_v26 = vmul.f32 %v697_v20, %v617_v18  ;;  %v656_v38 = vadd.f32 1.4214138, %v652_v27 }
  0x5a   : > { %v674_v28 = vmul.f32 %v1370_v52, %v670_v22  ;;  %v667_v43 = vmul.f32 %v1372_v59, %v663_v33  ;;  %v606_v52 = vmul.f32 0.5, %v1626_v31  ;;  %v740_v22 = vld [vmem:[%s1543_s22 + $0x6] sm:$0x3] }
  0x5b   : > { %v705_v35 = vadd.f32 1.0, %v701_v26  ;;  %v660_v45 = vmul.f32 %v1376_v8, %v656_v38 }
  0x5c   : > { %v694_v42 = vmul.f32 %v1378_v36, %v674_v28  ;;  %v671_v48 = vadd.f32 0.2548296, %v667_v43 }
  0x5d   : > { %v709_v44 = vmul.f32 %v705_v35, %v605_v9  ;;  %v664_v51 = vadd.f32 -0.28449672, %v660_v45  ;;  %v744_v9 = vunpack.c.l.bf16 %v740_v22 }
  0x5e   : > { %v698_v47 = vsub.f32 1.0, %v694_v42  ;;  %v675_v53 = vmul.f32 %v1372_v59, %v671_v48  ;;  %v742_v59 = vunpack.c.l.bf16 %v738_v58 }
  0x5f   : > { %v720_v50 = vmul.f32 %v1655_v39, %v709_v44  ;;  %v668_v54 = vmul.f32 %v1376_v8, %v664_v51 }
  0x60   : > { %v702_v10 = vmul.f32 %v698_v47, %v618_v46  ;;  %v695_v56 = vmul.f32 %v1380_v49, %v675_v53 }
  0x61   : > { %v731_v11 = vadd.f32 %v1268_v15, %v720_v50  ;;  %v672_v60 = vadd.f32 0.2548296, %v668_v54 }
  0x62   : > { %v706_v55 = vadd.f32 1.0, %v702_v10  ;;  %v699_v63 = vsub.f32 1.0, %v695_v56 }
  0x63   : > { %v745_v57 = vadd.f32 %v741_v24, %v731_v11  ;;  %v676_v31 = vmul.f32 %v1376_v8, %v672_v60  ;;  %v739_v8 = vld [vmem:[%s1543_s22 + $0x4] sm:$0x3] }
  0x64   : > { %v710_v62 = vmul.f32 %v706_v55, %v606_v52  ;;  %v703_v5 = vmul.f32 %v699_v63, %v619_v30  ;;  %v743_v19 = vunpack.c.l.bf16 %v739_v8 }
  0x65   : > { %v753_v1 = vpack.c.bf16 %v745_v57, %v745_v57  ;;  %v696_v29 = vmul.f32 %v1382_v61, %v676_v31 }
  0x66   : > { %v721_v41 = vmul.f32 %v1655_v39, %v710_v62  ;;  %v707_v7 = vadd.f32 1.0, %v703_v5 }
  0x67   : > { %1311 = vmatmul.mubr.msk.bf16.vlgmr.msra.gmra.mxu0 %vm773_vm7, %v753_v1  ;;  %v700_v12 = vsub.f32 1.0, %v696_v29 }
  0x68   : > { %1323 = vmatpush3.bf16.msra.mxu0 %v1499_v0  ;;  %v732_v6 = vadd.f32 %v1268_v15, %v721_v41  ;;  %1326 = vmatprep.mubr.msk.bf16.mxu0 %vm1424_vm2, %v1423_v2  ;;  %v711_v23 = vmul.f32 %v707_v7, %v607_v4 }
  0x69   : > { %1324 = vmatprep.subr.bf16.mxu0 %v1423_v2  ;;  %v704_v16 = vmul.f32 %v700_v12, %v620_v37 }
  0x6a   : > { %v746_v13 = vadd.f32 %v742_v59, %v732_v6  ;;  %v722_v32 = vmul.f32 %v1655_v39, %v711_v23 }
  0x6b   : > { %v708_v20 = vadd.f32 1.0, %v704_v16 }
  0x6c   : > { %1325 = vmatpush3.bf16.msra.mxu0 %v1507_v3  ;;  %v863_v18 = vpack.c.bf16 %v746_v13, %v746_v13  ;;  %v733_v21 = vadd.f32 %v1268_v15, %v722_v32 }
  0x6d   : > { %v712_v25 = vmul.f32 %v708_v20, %v608_v14 }
  0x6e   : > { %1319 = vmatmul.mubr.msk.bf16.vlgmr.msra.gmra.mxu1 %vm773_vm7, %v863_v18  ;;  %v747_v36 = vadd.f32 %v743_v19, %v733_v21 }
  0x6f   : > { %1331 = vmatpush3.bf16.msra.mxu1 %v1499_v0  ;;  %1334 = vmatprep.mubr.msk.bf16.mxu1 %vm1424_vm2, %v1423_v2  ;;  %v723_v34 = vmul.f32 %v1655_v39, %v712_v25  ;;  %v1269_v0 = vld [vmem:[%s1765_s6] ss:$0 sm:$0xff] }
  0x70   : > { %1332 = vmatprep.subr.bf16.mxu1 %v1423_v2  ;;  %v960_v26 = vpack.c.bf16 %v747_v36, %v747_v36 }
  0x71   : > { %v734_v27 = vadd.f32 %v1268_v15, %v723_v34 }
  0x72   : > { %1327 = vmatmul.mubr.msk.bf16.vlgmr.msra.gmra.mxu0 %vm773_vm7, %v960_v26 }
  0x73   : > { %1333 = vmatpush3.bf16.msra.mxu1 %v1507_v3  ;;  %v748_v28 = vadd.f32 %v744_v9, %v734_v27 }
  0x75   : > { %v1057_v33 = vpack.c.bf16 %v748_v28, %v748_v28 }
  0x77   : > { %1335 = vmatmul.mubr.msk.bf16.vlgmr.msra.gmra.mxu1 %vm773_vm7, %v1057_v33 }
 0x127   : > { %v811_v35 = vpop.f32.mrf.mxu0 }
 0x128   : > { %v1693_v38 = vadd.f32 %v1269_v0, %v811_v35 }
 0x129   : > { %v1312_v2 = vpop.f32.mrf.mxu0 }
 0x12a   : > { %v1696_v39 = vmul.f32 0.70710677, %v1693_v38 }
 0x12b   : > { %v814_v40 = vpop.f32.mrf.mxu0 }
 0x12c   : > { %v821_v3 = vand.u32 2147483647, %v1696_v39  ;;  %vm819_vm9 = vcmp.ge.f32.partialorder %v1696_v39, 0.0 }
 0x12d   : > { %v1313_v42 = vpop.f32.mrf.mxu0 }
 0x12e   : > { %v822_v43 = vmul.f32 0.3275911, %v821_v3  ;;  %v908_v44 = vpop.f32.mrf.mxu1  ;;  %v835_v53 = vsub.f32 0.0, %v821_v3 }
 0x12f   : > { %v1699_v46 = vadd.f32 %v1269_v0, %v908_v44 }
 0x130   : > { %v823_v45 = vadd.f32 1.0, %v822_v43  ;;  %v1320_v15 = vpop.f32.mrf.mxu1  ;;  %v836_v60 = vmul.f32 %v835_v53, %v821_v3 }
 0x131   : > { %v1702_v47 = vmul.f32 0.70710677, %v1699_v46 }
 0x132   : > { %1383 = vrcp.f32 %v823_v45  ;;  %v911_v48 = vpop.f32.mrf.mxu1  ;;  %v1005_v50 = vpop.f32.mrf.mxu0  ;;  %v837_v4 = vmul.f32 1.442695, %v836_v60 }
 0x133   : > { %v918_v49 = vand.u32 2147483647, %v1702_v47  ;;  %v1705_v52 = vadd.f32 %v1269_v0, %v1005_v50  ;;  %vm916_vm10 = vcmp.ge.f32.partialorder %v1702_v47, 0.0 }
 0x134   : > { %v1321_v24 = vpop.f32.mrf.mxu1  ;;  %v1328_v10 = vpop.f32.mrf.mxu0 }
 0x135   : > { %v919_v51 = vmul.f32 0.3275911, %v918_v49  ;;  %v1708_v54 = vmul.f32 0.70710677, %v1705_v52  ;;  %v932_v5 = vsub.f32 0.0, %v918_v49  ;;  %v820_v10 = vsel %vm819_vm9, 1.0, %v1425_v17 }
 0x136   : > { %v1008_v55 = vpop.f32.mrf.mxu0 }
 0x137   : > { %v920_v11 = vadd.f32 1.0, %v919_v51  ;;  %v1015_v56 = vand.u32 2147483647, %v1708_v54  ;;  %v1102_v57 = vpop.f32.mrf.mxu1  ;;  %v933_v12 = vmul.f32 %v932_v5, %v918_v49  ;;  %v1274_v5 = vld [vmem:[%s1767_s8] ss:$0 sm:$0xff]  ;;  %vm1013_vm12 = vcmp.ge.f32.partialorder %v1708_v54, 0.0 }
 0x138   : > { %v1329_v58 = vpop.f32.mrf.mxu0  ;;  %v1711_v30 = vadd.f32 %v1269_v0, %v1102_v57  ;;  %v1011_v54 = vmul.f32 0.5, %v1705_v52 }
 0x139   : > { %1385 = vrcp.f32 %v920_v11  ;;  %v1016_v61 = vmul.f32 0.3275911, %v1015_v56  ;;  %v1336_v62 = vpop.f32.mrf.mxu1  ;;  %v1029_v23 = vsub.f32 0.0, %v1015_v56  ;;  %v934_v32 = vmul.f32 1.442695, %v933_v12 }
 0x13a   : > { %v1714_v63 = vmul.f32 0.70710677, %v1711_v30 }
 0x13b   : > { %v1017_v1 = vadd.f32 1.0, %v1016_v61  ;;  %v1105_v31 = vpop.f32.mrf.mxu1  ;;  %v1030_v21 = vmul.f32 %v1029_v23, %v1015_v56  ;;  %v817_v61 = vmul.f32 0.5, %v1693_v38 }
 0x13c   : > { %v1112_v41 = vand.u32 2147483647, %v1714_v63  ;;  %vm1110_vm13 = vcmp.ge.f32.partialorder %v1714_v63, 0.0 }
 0x13d   : > { %1387 = vrcp.f32 %v1017_v1  ;;  %v1337_v29 = vpop.f32.mrf.mxu1  ;;  %v1031_v28 = vmul.f32 1.442695, %v1030_v21  ;;  %v1273_v1 = vld [vmem:[%s1766_s7] ss:$0 sm:$0xff] }
 0x13e   : > { %v1113_v7 = vmul.f32 0.3275911, %v1112_v41  ;;  %1389 = vpow2.f32 %v837_v4  ;;  %v1126_v25 = vsub.f32 0.0, %v1112_v41 }
 0x13f   : > { %v1384_v59 = vpop.eup %1383 }
 0x140   : > { %v826_v6 = vmul.f32 1.0614054, %v1384_v59  ;;  %v1114_v8 = vadd.f32 1.0, %v1113_v7  ;;  %v1127_v0 = vmul.f32 %v1126_v25, %v1112_v41  ;;  %v917_v7 = vsel %vm916_vm10, 1.0, %v1425_v17 }
 0x142   : > { %v827_v37 = vadd.f32 -1.4531521, %v826_v6  ;;  %1391 = vrcp.f32 %v1114_v8  ;;  %v1128_v48 = vmul.f32 1.442695, %v1127_v0 }
 0x143   : > { %1393 = vpow2.f32 %v934_v32 }
 0x144   : > { %v828_v13 = vmul.f32 %v1384_v59, %v827_v37  ;;  %1395 = vpow2.f32 %v1031_v28 }
 0x145   : > { %1397 = vpow2.f32 %v1128_v48 }
 0x146   : > { %v1386_v14 = vpop.eup %1385  ;;  %v829_v16 = vadd.f32 1.4214138, %v828_v13 }
 0x147   : > { %v923_v18 = vmul.f32 1.0614054, %v1386_v14 }
 0x148   : > { %v830_v19 = vmul.f32 %v1384_v59, %v829_v16 }
 0x149   : > { %v924_v20 = vadd.f32 -1.4531521, %v923_v18 }
 0x14a   : > { %v831_v22 = vadd.f32 -0.28449672, %v830_v19  ;;  %v1388_v34 = vpop.eup %1387 }
 0x14b   : > { %v925_v36 = vmul.f32 %v1386_v14, %v924_v20  ;;  %v1020_v27 = vmul.f32 1.0614054, %v1388_v34  ;;  %v1390_v40 = vpop.eup %1389 }
 0x14c   : > { %v832_v9 = vmul.f32 %v1384_v59, %v831_v22  ;;  %v1014_v22 = vsel %vm1013_vm12, 1.0, %v1425_v17 }
 0x14d   : > { %v926_v26 = vadd.f32 1.4214138, %v925_v36  ;;  %v1021_v2 = vadd.f32 -1.4531521, %v1020_v27 }
 0x14e   : > { %v833_v33 = vadd.f32 0.2548296, %v832_v9 }
 0x14f   : > { %v927_v35 = vmul.f32 %v1386_v14, %v926_v26  ;;  %v1392_v42 = vpop.eup %1391  ;;  %v1022_v44 = vmul.f32 %v1388_v34, %v1021_v2 }
 0x150   : > { %v834_v3 = vmul.f32 %v1384_v59, %v833_v33  ;;  %v1117_v15 = vmul.f32 1.0614054, %v1392_v42  ;;  %v1394_v60 = vpop.eup %1393 }
 0x151   : > { %v928_v43 = vadd.f32 -0.28449672, %v927_v35  ;;  %v1023_v50 = vadd.f32 1.4214138, %v1022_v44  ;;  %v1396_v13 = vpop.eup %1395  ;;  %v1111_v35 = vsel %vm1110_vm13, 1.0, %v1425_v17 }
 0x152   : > { %v839_v45 = vmul.f32 %v1390_v40, %v834_v3  ;;  %v1118_v51 = vadd.f32 -1.4531521, %v1117_v15  ;;  %v1398_v36 = vpop.eup %1397  ;;  %v1108_v3 = vmul.f32 0.5, %v1711_v30 }
 0x153   : > { %v929_v49 = vmul.f32 %v1386_v14, %v928_v43  ;;  %v1024_v11 = vmul.f32 %v1388_v34, %v1023_v50 }
 0x154   : > { %v840_v24 = vsub.f32 1.0, %v839_v45  ;;  %v1119_v56 = vmul.f32 %v1392_v42, %v1118_v51 }
 0x155   : > { %v930_v53 = vadd.f32 0.2548296, %v929_v49  ;;  %v1025_v58 = vadd.f32 -0.28449672, %v1024_v11 }
 0x156   : > { %v841_v55 = vmul.f32 %v840_v24, %v820_v10  ;;  %v1120_v62 = vadd.f32 1.4214138, %v1119_v56 }
 0x157   : > { %v931_v57 = vmul.f32 %v1386_v14, %v930_v53  ;;  %v1026_v41 = vmul.f32 %v1388_v34, %v1025_v58  ;;  %v914_v14 = vmul.f32 0.5, %v1699_v46 }
 0x158   : > { %v842_v39 = vadd.f32 1.0, %v841_v55  ;;  %v1121_v4 = vmul.f32 %v1392_v42, %v1120_v62 }
 0x159   : > { %v936_v31 = vmul.f32 %v1394_v60, %v931_v57  ;;  %v1027_v6 = vadd.f32 0.2548296, %v1026_v41 }
 0x15a   : > { %v843_v59 = vmul.f32 %v842_v39, %v817_v61  ;;  %v1122_v37 = vadd.f32 -0.28449672, %v1121_v4 }
 0x15b   : > { %v937_v29 = vsub.f32 1.0, %v936_v31  ;;  %v1028_v12 = vmul.f32 %v1388_v34, %v1027_v6 }
 0x15c   : > { %v851_v38 = vmul.f32 %v1273_v1, %v843_v59  ;;  %v1123_v47 = vmul.f32 %v1392_v42, %v1122_v37 }
 0x15d   : > { %v938_v8 = vmul.f32 %v937_v29, %v917_v7  ;;  %v1033_v18 = vmul.f32 %v1396_v13, %v1028_v12 }
 0x15e   : > { %v859_v23 = vadd.f32 %v1274_v5, %v851_v38  ;;  %v1124_v19 = vadd.f32 0.2548296, %v1123_v47 }
 0x15f   : > { %v939_v16 = vadd.f32 1.0, %v938_v8  ;;  %v1034_v21 = vsub.f32 1.0, %v1033_v18 }
 0x160   : > { %v860_v32 = vpack.c.bf16 %v859_v23, %v859_v23  ;;  %v1125_v25 = vmul.f32 %v1392_v42, %v1124_v19 }
 0x161   : > { %v940_v20 = vmul.f32 %v939_v16, %v914_v14  ;;  %v1035_v9 = vmul.f32 %v1034_v21, %v1014_v22 }
 0x162   : > { %862 = vst.msk [vmem:[%s1733_s25] sm:$0x3] %vm861_vm11, %v860_v32  ;;  %v1130_v46 = vmul.f32 %v1398_v36, %v1125_v25 }
 0x163   : > { %v948_v34 = vmul.f32 %v1273_v1, %v940_v20  ;;  %v1036_v27 = vadd.f32 1.0, %v1035_v9 }
 0x164   : > { %v1131_v28 = vsub.f32 1.0, %v1130_v46 }
 0x165   : > { %v956_v26 = vadd.f32 %v1274_v5, %v948_v34  ;;  %v1037_v0 = vmul.f32 %v1036_v27, %v1011_v54 }
 0x166   : > { %v1132_v2 = vmul.f32 %v1131_v28, %v1111_v35 }
 0x167   : > { %v957_v33 = vpack.c.bf16 %v956_v26, %v956_v26  ;;  %v1045_v40 = vmul.f32 %v1273_v1, %v1037_v0 }
 0x168   : > { %v1133_v42 = vadd.f32 1.0, %v1132_v2 }
 0x169   : > { %1279 = vst.msk [vmem:[%s1733_s25 + $0x2] sm:$0x3] %vm861_vm11, %v957_v33  ;;  %v1053_v63 = vadd.f32 %v1274_v5, %v1045_v40 }
 0x16a   : > { %v1134_v43 = vmul.f32 %v1133_v42, %v1108_v3 }
 0x16b   : > { %v1054_v44 = vpack.c.bf16 %v1053_v63, %v1053_v63 }
 0x16c   : > { %v1142_v45 = vmul.f32 %v1273_v1, %v1134_v43 }
 0x16d   : > { %1284 = vst.msk [vmem:[%s1733_s25 + $0x4] sm:$0x3] %vm861_vm11, %v1054_v44 }
 0x16e   : > { %v1150_v52 = vadd.f32 %v1274_v5, %v1142_v45 }
 0x170   : > { %v1151_v15 = vpack.c.bf16 %v1150_v52, %v1150_v52 }
 0x172   : > { %1289 = vst.msk [vmem:[%s1733_s25 + $0x6] sm:$0x3] %vm861_vm11, %v1151_v15 }
 0x173 PF: > { %s19_s11 = sadd.s32 1, %s1421_s11   ;;  %s1769_s30 = smov %s1417_s10 }
 0x174   : > { %p16_p5 = scmp.ge.s32.totalorder %s19_s11, 4   ;;  %s1770_s10 = smov %s1772_s12 }
 0x176   :  { %18 = sbr.rel (!%p16_p5) target bundleno = 2 (0x2), region = 101 }

</bundles_post_ra>
